<compile_context>
chip_gen: v7x
topology: tpu7x:2x2x1
jax: 0.10.0
libtpu: 0.0.40
codegen_flags: <defaults>
</compile_context>

<pallas_src>
from functools import partial

import jax
import jax.numpy as jnp
from jax.experimental import pallas as pl
from jax.experimental.pallas import tpu as pltpu

K = 4        # depthwise conv kernel size (module default)
EPS = 1e-5   # nn.InstanceNorm2d default eps


def tfar_kernel(m_ref, n_ref, w_ref, aff_ref, seg_ref, out_ref, *, Tc, Fc, CF):
    """One batch slab, all channels at once.

    m_ref, n_ref : (1, T, C*F)   packed activations (channel-major lane axis)
    w_ref        : (3*K*K, C*F)  per-tap per-channel weights (broadcast over F)
    aff_ref      : (6, C*F)      rows [g1, b1, g2, b2, g3, b3] (broadcast over F)
    seg_ref      : (C*F, C*F)    masked per-channel segment-sum + broadcast matrix
    out_ref      : (1, Tc, C*F)  combined (pre-upsample) output
    """
    KK = K * K
    x_m = m_ref[0].astype(jnp.float32)     # (T, CF)
    x_n = n_ref[0].astype(jnp.float32)

    acc1 = jnp.zeros((Tc, CF), jnp.float32)   # W1(n)
    acc2 = jnp.zeros((Tc, CF), jnp.float32)   # W2(m)
    acc3 = jnp.zeros((Tc, CF), jnp.float32)   # W3(n)

    for q in range(K):
        # Lane shift by q == within-channel frequency shift.  Wrapped lanes
        # only ever land in the invalid f >= Fc tail of a channel block.
        if q == 0:
            xm_q, xn_q = x_m, x_n
        else:
            xm_q = pltpu.roll(x_m, shift=CF - q, axis=1)
            xn_q = pltpu.roll(x_n, shift=CF - q, axis=1)
        for p in range(K):
            xm_pq = xm_q[p:p + Tc, :]
            xn_pq = xn_q[p:p + Tc, :]          # shared by branches 1 and 3
            tap = p * K + q
            acc1 = acc1 + w_ref[0 * KK + tap:0 * KK + tap + 1, :] * xn_pq
            acc2 = acc2 + w_ref[1 * KK + tap:1 * KK + tap + 1, :] * xm_pq
            acc3 = acc3 + w_ref[2 * KK + tap:2 * KK + tap + 1, :] * xn_pq

    # InstanceNorm statistics: reduce sublanes, then one batched MXU matmul
    # does the masked per-channel lane reduction and the broadcast back to a
    # (1, CF) lane vector in a single pass.
    rows = jnp.concatenate([
        jnp.sum(acc1, axis=0, keepdims=True),
        jnp.sum(acc1 * acc1, axis=0, keepdims=True),
        jnp.sum(acc2, axis=0, keepdims=True),
        jnp.sum(acc2 * acc2, axis=0, keepdims=True),
        jnp.sum(acc3, axis=0, keepdims=True),
        jnp.sum(acc3 * acc3, axis=0, keepdims=True),
        jnp.zeros((2, CF), jnp.float32),
    ], axis=0)                                                   # (8, CF)
    stats = jnp.dot(rows, seg_ref[...], preferred_element_type=jnp.float32)

    inv_count = 1.0 / (Tc * Fc)

    def inorm(acc, branch):
        mean = stats[2 * branch:2 * branch + 1, :] * inv_count       # (1, CF)
        ex2 = stats[2 * branch + 1:2 * branch + 2, :] * inv_count
        var = ex2 - mean * mean                                      # biased (PyTorch)
        gamma = aff_ref[2 * branch:2 * branch + 1, :]
        beta = aff_ref[2 * branch + 1:2 * branch + 2, :]
        return (acc - mean) * jax.lax.rsqrt(var + EPS) * gamma + beta

    t1 = jax.nn.sigmoid(inorm(acc1, 0))   # sigmoid(W1(n))
    t2 = inorm(acc2, 1)                   # W2(m)
    t3 = inorm(acc3, 2)                   # W3(n)

    out_ref[0] = (t1 * t2 + t3).astype(out_ref.dtype)


def tfar_unit(m, n, conv_w, gamma, beta):
    """m, n: (B, C, T, F); conv_w: (3*C, K*K); gamma, beta: (3, C)."""
    B, C, T, F = m.shape
    Tc, Fc = T - K + 1, F - K + 1
    CF = C * F                       # lane axis width (128 here -> lane-dense)
    KK = K * K

    # ---- pack activations: channel-major lane axis (B, T, C*F) ---------------
    m_p = jnp.transpose(m, (0, 2, 1, 3)).reshape(B, T, CF)
    n_p = jnp.transpose(n, (0, 2, 1, 3)).reshape(B, T, CF)

    # ---- per-tap per-channel weight lane vectors ------------------------------
    w = conv_w.reshape(3, C, KK).transpose(0, 2, 1)            # (3, KK, C)
    wvec = jnp.repeat(w, F, axis=2).reshape(3 * KK, CF).astype(jnp.float32)

    # ---- affine params as lane vectors ----------------------------------------
    g = jnp.repeat(gamma, F, axis=1)                            # (3, CF)
    b = jnp.repeat(beta, F, axis=1)
    aff = jnp.stack([g[0], b[0], g[1], b[1], g[2], b[2]], axis=0).astype(jnp.float32)

    # ---- masked per-channel segment-sum + broadcast matrix --------------------
    lane = jnp.arange(CF)
    same_ch = (lane[:, None] // F) == (lane[None, :] // F)
    valid = (lane % F) < Fc
    seg = (same_ch & valid[:, None]).astype(jnp.float32)        # (CF, CF)

    kernel = partial(tfar_kernel, Tc=Tc, Fc=Fc, CF=CF)
    comb = pl.pallas_call(
        kernel,
        out_shape=jax.ShapeDtypeStruct((B, Tc, CF), jnp.float32),
        grid=(B,),
        in_specs=[
            pl.BlockSpec((1, T, CF), lambda bi: (bi, 0, 0)),    # m packed
            pl.BlockSpec((1, T, CF), lambda bi: (bi, 0, 0)),    # n packed
            pl.BlockSpec((3 * KK, CF), lambda bi: (0, 0)),      # conv weights
            pl.BlockSpec((6, CF), lambda bi: (0, 0)),           # affine params
            pl.BlockSpec((CF, CF), lambda bi: (0, 0)),          # segment-sum matrix
        ],
        out_specs=pl.BlockSpec((1, Tc, CF), lambda bi: (bi, 0, 0)),
        compiler_params=pltpu.CompilerParams(
            dimension_semantics=("parallel",)),
    )(m_p, n_p, wvec, aff, seg)

    # ---- unpack + nearest upsample (pure static index selection) --------------
    comb = comb.reshape(B, Tc, C, F)[:, :, :, :Fc]              # drop invalid lanes
    comb = jnp.transpose(comb, (0, 2, 1, 3))                    # (B, C, Tc, Fc)
    ti = (jnp.arange(T) * Tc) // T                              # torch 'nearest'
    fi = (jnp.arange(F) * Fc) // F
    return comb[:, :, ti, :][:, :, :, fi].astype(m.dtype)


def ref_tfar(m, n, conv_w, gamma, beta):
    """Pure-JAX reference mirroring the PyTorch forward pass."""
    B, C, T, F = m.shape
    Tc, Fc = T - K + 1, F - K + 1

    def branch(x, i):
        w = conv_w[i * C:(i + 1) * C].reshape(C, 1, K, K)
        y = jax.lax.conv_general_dilated(
            x, w, window_strides=(1, 1), padding='VALID',
            dimension_numbers=('NCHW', 'OIHW', 'NCHW'), feature_group_count=C)
        mean = jnp.mean(y, axis=(2, 3), keepdims=True)
        var = jnp.mean((y - mean) ** 2, axis=(2, 3), keepdims=True)
        yhat = (y - mean) / jnp.sqrt(var + EPS)
        return yhat * gamma[i].reshape(1, C, 1, 1) + beta[i].reshape(1, C, 1, 1)

    t1 = jax.nn.sigmoid(branch(n, 0))
    t2 = branch(m, 1)
    t3 = branch(n, 2)

    ti = (jnp.arange(T) * Tc) // T
    fi = (jnp.arange(F) * Fc) // F
    up = lambda x: x[:, :, ti, :][:, :, :, fi]
    return up(t1) * up(t2) + up(t3)


if __name__ == "__main__":
    B, C, T, F = 2, 8, 16, 16     # C*F = 128 -> fully lane-dense packing
    key = jax.random.PRNGKey(0)
    k1, k2, k3, k4, k5 = jax.random.split(key, 5)

    m = jax.random.normal(k1, (B, C, T, F), jnp.float32)
    n = jax.random.normal(k2, (B, C, T, F), jnp.float32)

    # depthwise conv weights (3 branches, flattened (3*C, K*K)) and
    # InstanceNorm affine params per branch/channel
    conv_w = jax.random.normal(k3, (3 * C, K * K), jnp.float32) * 0.25
    gamma = 1.0 + 0.1 * jax.random.normal(k4, (3, C), jnp.float32)
    beta = 0.1 * jax.random.normal(k5, (3, C), jnp.float32)

    out = tfar_unit(m, n, conv_w, gamma, beta)
    jax.block_until_ready(out)

    ref = ref_tfar(m, n, conv_w, gamma, beta)
    err = float(jnp.max(jnp.abs(out - ref)))
    assert jnp.allclose(out, ref, atol=1e-4, rtol=1e-4), f"max abs err {err}"

    print("KERNEL_OK")
</pallas_src>

<mosaic_0001>
module attributes {stable_mosaic.version = 11 : i64} {
  func.func @tfar_kernel(%arg0: i32, %arg1: memref<1x16x128xf32, #tpu.memory_space<vmem>>, %arg2: memref<1x16x128xf32, #tpu.memory_space<vmem>>, %arg3: memref<48x128xf32, #tpu.memory_space<vmem>>, %arg4: memref<6x128xf32, #tpu.memory_space<vmem>>, %arg5: memref<128x128xf32, #tpu.memory_space<vmem>>, %arg6: memref<1x13x128xf32, #tpu.memory_space<vmem>>) attributes {dimension_semantics = [#tpu.dimension_semantics<parallel>], iteration_bounds = array<i64: 2>, scalar_prefetch = 0 : i64, scratch_operands = 0 : i64, tpu.core_type = #tpu.core_type<tc>, window_params = [{transform_indices = @transform_0, window_bounds = array<i64: 1, 16, 128>}, {transform_indices = @transform_1, window_bounds = array<i64: 1, 16, 128>}, {pipeline_mode = #tpu.pipeline_mode<synchronous>, transform_indices = @transform_2, window_bounds = array<i64: 48, 128>}, {pipeline_mode = #tpu.pipeline_mode<synchronous>, transform_indices = @transform_3, window_bounds = array<i64: 6, 128>}, {pipeline_mode = #tpu.pipeline_mode<synchronous>, transform_indices = @transform_4, window_bounds = array<i64: 128, 128>}, {transform_indices = @transform_5, window_bounds = array<i64: 1, 13, 128>}]} {
    %c0 = arith.constant 0 : index
    %c0_0 = arith.constant 0 : index
    %c0_1 = arith.constant 0 : index
    %0 = vector.load %arg1[%c0, %c0_0, %c0_1] : memref<1x16x128xf32, #tpu.memory_space<vmem>>, vector<1x16x128xf32>
    %1 = vector.shape_cast %0 : vector<1x16x128xf32> to vector<16x128xf32>
    %c0_2 = arith.constant 0 : index
    %c0_3 = arith.constant 0 : index
    %c0_4 = arith.constant 0 : index
    %2 = vector.load %arg2[%c0_2, %c0_3, %c0_4] : memref<1x16x128xf32, #tpu.memory_space<vmem>>, vector<1x16x128xf32>
    %3 = vector.shape_cast %2 : vector<1x16x128xf32> to vector<16x128xf32>
    %cst = arith.constant 0.000000e+00 : f32
    %4 = vector.broadcast %cst : f32 to vector<13x128xf32>
    %cst_5 = arith.constant 0.000000e+00 : f32
    %5 = vector.broadcast %cst_5 : f32 to vector<13x128xf32>
    %cst_6 = arith.constant 0.000000e+00 : f32
    %6 = vector.broadcast %cst_6 : f32 to vector<13x128xf32>
    %7 = vector.extract_strided_slice %1 {offsets = [0, 0], sizes = [13, 128], strides = [1, 1]} : vector<16x128xf32> to vector<13x128xf32>
    %8 = vector.extract_strided_slice %3 {offsets = [0, 0], sizes = [13, 128], strides = [1, 1]} : vector<16x128xf32> to vector<13x128xf32>
    %c0_7 = arith.constant 0 : index
    %c0_8 = arith.constant 0 : index
    %9 = vector.load %arg3[%c0_7, %c0_8] : memref<48x128xf32, #tpu.memory_space<vmem>>, vector<1x128xf32>
    %10 = vector.broadcast %9 : vector<1x128xf32> to vector<13x128xf32>
    %11 = arith.mulf %10, %8 : vector<13x128xf32>
    %12 = arith.addf %4, %11 : vector<13x128xf32>
    %c16 = arith.constant 16 : index
    %c0_9 = arith.constant 0 : index
    %13 = vector.load %arg3[%c16, %c0_9] : memref<48x128xf32, #tpu.memory_space<vmem>>, vector<1x128xf32>
    %14 = vector.broadcast %13 : vector<1x128xf32> to vector<13x128xf32>
    %15 = arith.mulf %14, %7 : vector<13x128xf32>
    %16 = arith.addf %5, %15 : vector<13x128xf32>
    %c32 = arith.constant 32 : index
    %c0_10 = arith.constant 0 : index
    %17 = vector.load %arg3[%c32, %c0_10] : memref<48x128xf32, #tpu.memory_space<vmem>>, vector<1x128xf32>
    %18 = vector.broadcast %17 : vector<1x128xf32> to vector<13x128xf32>
    %19 = arith.mulf %18, %8 : vector<13x128xf32>
    %20 = arith.addf %6, %19 : vector<13x128xf32>
    %21 = vector.extract_strided_slice %1 {offsets = [1, 0], sizes = [13, 128], strides = [1, 1]} : vector<16x128xf32> to vector<13x128xf32>
    %22 = vector.extract_strided_slice %3 {offsets = [1, 0], sizes = [13, 128], strides = [1, 1]} : vector<16x128xf32> to vector<13x128xf32>
    %c4 = arith.constant 4 : index
    %c0_11 = arith.constant 0 : index
    %23 = vector.load %arg3[%c4, %c0_11] : memref<48x128xf32, #tpu.memory_space<vmem>>, vector<1x128xf32>
    %24 = vector.broadcast %23 : vector<1x128xf32> to vector<13x128xf32>
    %25 = arith.mulf %24, %22 : vector<13x128xf32>
    %26 = arith.addf %12, %25 : vector<13x128xf32>
    %c20 = arith.constant 20 : index
    %c0_12 = arith.constant 0 : index
    %27 = vector.load %arg3[%c20, %c0_12] : memref<48x128xf32, #tpu.memory_space<vmem>>, vector<1x128xf32>
    %28 = vector.broadcast %27 : vector<1x128xf32> to vector<13x128xf32>
    %29 = arith.mulf %28, %21 : vector<13x128xf32>
    %30 = arith.addf %16, %29 : vector<13x128xf32>
    %c36 = arith.constant 36 : index
    %c0_13 = arith.constant 0 : index
    %31 = vector.load %arg3[%c36, %c0_13] : memref<48x128xf32, #tpu.memory_space<vmem>>, vector<1x128xf32>
    %32 = vector.broadcast %31 : vector<1x128xf32> to vector<13x128xf32>
    %33 = arith.mulf %32, %22 : vector<13x128xf32>
    %34 = arith.addf %20, %33 : vector<13x128xf32>
    %35 = vector.extract_strided_slice %1 {offsets = [2, 0], sizes = [13, 128], strides = [1, 1]} : vector<16x128xf32> to vector<13x128xf32>
    %36 = vector.extract_strided_slice %3 {offsets = [2, 0], sizes = [13, 128], strides = [1, 1]} : vector<16x128xf32> to vector<13x128xf32>
    %c8 = arith.constant 8 : index
    %c0_14 = arith.constant 0 : index
    %37 = vector.load %arg3[%c8, %c0_14] : memref<48x128xf32, #tpu.memory_space<vmem>>, vector<1x128xf32>
    %38 = vector.broadcast %37 : vector<1x128xf32> to vector<13x128xf32>
    %39 = arith.mulf %38, %36 : vector<13x128xf32>
    %40 = arith.addf %26, %39 : vector<13x128xf32>
    %c24 = arith.constant 24 : index
    %c0_15 = arith.constant 0 : index
    %41 = vector.load %arg3[%c24, %c0_15] : memref<48x128xf32, #tpu.memory_space<vmem>>, vector<1x128xf32>
    %42 = vector.broadcast %41 : vector<1x128xf32> to vector<13x128xf32>
    %43 = arith.mulf %42, %35 : vector<13x128xf32>
    %44 = arith.addf %30, %43 : vector<13x128xf32>
    %c40 = arith.constant 40 : index
    %c0_16 = arith.constant 0 : index
    %45 = vector.load %arg3[%c40, %c0_16] : memref<48x128xf32, #tpu.memory_space<vmem>>, vector<1x128xf32>
    %46 = vector.broadcast %45 : vector<1x128xf32> to vector<13x128xf32>
    %47 = arith.mulf %46, %36 : vector<13x128xf32>
    %48 = arith.addf %34, %47 : vector<13x128xf32>
    %49 = vector.extract_strided_slice %1 {offsets = [3, 0], sizes = [13, 128], strides = [1, 1]} : vector<16x128xf32> to vector<13x128xf32>
    %50 = vector.extract_strided_slice %3 {offsets = [3, 0], sizes = [13, 128], strides = [1, 1]} : vector<16x128xf32> to vector<13x128xf32>
    %c12 = arith.constant 12 : index
    %c0_17 = arith.constant 0 : index
    %51 = vector.load %arg3[%c12, %c0_17] : memref<48x128xf32, #tpu.memory_space<vmem>>, vector<1x128xf32>
    %52 = vector.broadcast %51 : vector<1x128xf32> to vector<13x128xf32>
    %53 = arith.mulf %52, %50 : vector<13x128xf32>
    %54 = arith.addf %40, %53 : vector<13x128xf32>
    %c28 = arith.constant 28 : index
    %c0_18 = arith.constant 0 : index
    %55 = vector.load %arg3[%c28, %c0_18] : memref<48x128xf32, #tpu.memory_space<vmem>>, vector<1x128xf32>
    %56 = vector.broadcast %55 : vector<1x128xf32> to vector<13x128xf32>
    %57 = arith.mulf %56, %49 : vector<13x128xf32>
    %58 = arith.addf %44, %57 : vector<13x128xf32>
    %c44 = arith.constant 44 : index
    %c0_19 = arith.constant 0 : index
    %59 = vector.load %arg3[%c44, %c0_19] : memref<48x128xf32, #tpu.memory_space<vmem>>, vector<1x128xf32>
    %60 = vector.broadcast %59 : vector<1x128xf32> to vector<13x128xf32>
    %61 = arith.mulf %60, %50 : vector<13x128xf32>
    %62 = arith.addf %48, %61 : vector<13x128xf32>
    %c127_i32 = arith.constant 127 : i32
    %63 = tpu.dynamic_rotate %1 by %c127_i32 dim 1 : vector<16x128xf32>, i32 -> vector<16x128xf32>
    %c127_i32_20 = arith.constant 127 : i32
    %64 = tpu.dynamic_rotate %3 by %c127_i32_20 dim 1 : vector<16x128xf32>, i32 -> vector<16x128xf32>
    %65 = vector.extract_strided_slice %63 {offsets = [0, 0], sizes = [13, 128], strides = [1, 1]} : vector<16x128xf32> to vector<13x128xf32>
    %66 = vector.extract_strided_slice %64 {offsets = [0, 0], sizes = [13, 128], strides = [1, 1]} : vector<16x128xf32> to vector<13x128xf32>
    %c1 = arith.constant 1 : index
    %c0_21 = arith.constant 0 : index
    %67 = vector.load %arg3[%c1, %c0_21] : memref<48x128xf32, #tpu.memory_space<vmem>>, vector<1x128xf32>
    %68 = vector.broadcast %67 : vector<1x128xf32> to vector<13x128xf32>
    %69 = arith.mulf %68, %66 : vector<13x128xf32>
    %70 = arith.addf %54, %69 : vector<13x128xf32>
    %c17 = arith.constant 17 : index
    %c0_22 = arith.constant 0 : index
    %71 = vector.load %arg3[%c17, %c0_22] : memref<48x128xf32, #tpu.memory_space<vmem>>, vector<1x128xf32>
    %72 = vector.broadcast %71 : vector<1x128xf32> to vector<13x128xf32>
    %73 = arith.mulf %72, %65 : vector<13x128xf32>
    %74 = arith.addf %58, %73 : vector<13x128xf32>
    %c33 = arith.constant 33 : index
    %c0_23 = arith.constant 0 : index
    %75 = vector.load %arg3[%c33, %c0_23] : memref<48x128xf32, #tpu.memory_space<vmem>>, vector<1x128xf32>
    %76 = vector.broadcast %75 : vector<1x128xf32> to vector<13x128xf32>
    %77 = arith.mulf %76, %66 : vector<13x128xf32>
    %78 = arith.addf %62, %77 : vector<13x128xf32>
    %79 = vector.extract_strided_slice %63 {offsets = [1, 0], sizes = [13, 128], strides = [1, 1]} : vector<16x128xf32> to vector<13x128xf32>
    %80 = vector.extract_strided_slice %64 {offsets = [1, 0], sizes = [13, 128], strides = [1, 1]} : vector<16x128xf32> to vector<13x128xf32>
    %c5 = arith.constant 5 : index
    %c0_24 = arith.constant 0 : index
    %81 = vector.load %arg3[%c5, %c0_24] : memref<48x128xf32, #tpu.memory_space<vmem>>, vector<1x128xf32>
    %82 = vector.broadcast %81 : vector<1x128xf32> to vector<13x128xf32>
    %83 = arith.mulf %82, %80 : vector<13x128xf32>
    %84 = arith.addf %70, %83 : vector<13x128xf32>
    %c21 = arith.constant 21 : index
    %c0_25 = arith.constant 0 : index
    %85 = vector.load %arg3[%c21, %c0_25] : memref<48x128xf32, #tpu.memory_space<vmem>>, vector<1x128xf32>
    %86 = vector.broadcast %85 : vector<1x128xf32> to vector<13x128xf32>
    %87 = arith.mulf %86, %79 : vector<13x128xf32>
    %88 = arith.addf %74, %87 : vector<13x128xf32>
    %c37 = arith.constant 37 : index
    %c0_26 = arith.constant 0 : index
    %89 = vector.load %arg3[%c37, %c0_26] : memref<48x128xf32, #tpu.memory_space<vmem>>, vector<1x128xf32>
    %90 = vector.broadcast %89 : vector<1x128xf32> to vector<13x128xf32>
    %91 = arith.mulf %90, %80 : vector<13x128xf32>
    %92 = arith.addf %78, %91 : vector<13x128xf32>
    %93 = vector.extract_strided_slice %63 {offsets = [2, 0], sizes = [13, 128], strides = [1, 1]} : vector<16x128xf32> to vector<13x128xf32>
    %94 = vector.extract_strided_slice %64 {offsets = [2, 0], sizes = [13, 128], strides = [1, 1]} : vector<16x128xf32> to vector<13x128xf32>
    %c9 = arith.constant 9 : index
    %c0_27 = arith.constant 0 : index
    %95 = vector.load %arg3[%c9, %c0_27] : memref<48x128xf32, #tpu.memory_space<vmem>>, vector<1x128xf32>
    %96 = vector.broadcast %95 : vector<1x128xf32> to vector<13x128xf32>
    %97 = arith.mulf %96, %94 : vector<13x128xf32>
    %98 = arith.addf %84, %97 : vector<13x128xf32>
    %c25 = arith.constant 25 : index
    %c0_28 = arith.constant 0 : index
    %99 = vector.load %arg3[%c25, %c0_28] : memref<48x128xf32, #tpu.memory_space<vmem>>, vector<1x128xf32>
    %100 = vector.broadcast %99 : vector<1x128xf32> to vector<13x128xf32>
    %101 = arith.mulf %100, %93 : vector<13x128xf32>
    %102 = arith.addf %88, %101 : vector<13x128xf32>
    %c41 = arith.constant 41 : index
    %c0_29 = arith.constant 0 : index
    %103 = vector.load %arg3[%c41, %c0_29] : memref<48x128xf32, #tpu.memory_space<vmem>>, vector<1x128xf32>
    %104 = vector.broadcast %103 : vector<1x128xf32> to vector<13x128xf32>
    %105 = arith.mulf %104, %94 : vector<13x128xf32>
    %106 = arith.addf %92, %105 : vector<13x128xf32>
    %107 = vector.extract_strided_slice %63 {offsets = [3, 0], sizes = [13, 128], strides = [1, 1]} : vector<16x128xf32> to vector<13x128xf32>
    %108 = vector.extract_strided_slice %64 {offsets = [3, 0], sizes = [13, 128], strides = [1, 1]} : vector<16x128xf32> to vector<13x128xf32>
    %c13 = arith.constant 13 : index
    %c0_30 = arith.constant 0 : index
    %109 = vector.load %arg3[%c13, %c0_30] : memref<48x128xf32, #tpu.memory_space<vmem>>, vector<1x128xf32>
    %110 = vector.broadcast %109 : vector<1x128xf32> to vector<13x128xf32>
    %111 = arith.mulf %110, %108 : vector<13x128xf32>
    %112 = arith.addf %98, %111 : vector<13x128xf32>
    %c29 = arith.constant 29 : index
    %c0_31 = arith.constant 0 : index
    %113 = vector.load %arg3[%c29, %c0_31] : memref<48x128xf32, #tpu.memory_space<vmem>>, vector<1x128xf32>
    %114 = vector.broadcast %113 : vector<1x128xf32> to vector<13x128xf32>
    %115 = arith.mulf %114, %107 : vector<13x128xf32>
    %116 = arith.addf %102, %115 : vector<13x128xf32>
    %c45 = arith.constant 45 : index
    %c0_32 = arith.constant 0 : index
    %117 = vector.load %arg3[%c45, %c0_32] : memref<48x128xf32, #tpu.memory_space<vmem>>, vector<1x128xf32>
    %118 = vector.broadcast %117 : vector<1x128xf32> to vector<13x128xf32>
    %119 = arith.mulf %118, %108 : vector<13x128xf32>
    %120 = arith.addf %106, %119 : vector<13x128xf32>
    %c126_i32 = arith.constant 126 : i32
    %121 = tpu.dynamic_rotate %1 by %c126_i32 dim 1 : vector<16x128xf32>, i32 -> vector<16x128xf32>
    %c126_i32_33 = arith.constant 126 : i32
    %122 = tpu.dynamic_rotate %3 by %c126_i32_33 dim 1 : vector<16x128xf32>, i32 -> vector<16x128xf32>
    %123 = vector.extract_strided_slice %121 {offsets = [0, 0], sizes = [13, 128], strides = [1, 1]} : vector<16x128xf32> to vector<13x128xf32>
    %124 = vector.extract_strided_slice %122 {offsets = [0, 0], sizes = [13, 128], strides = [1, 1]} : vector<16x128xf32> to vector<13x128xf32>
    %c2 = arith.constant 2 : index
    %c0_34 = arith.constant 0 : index
    %125 = vector.load %arg3[%c2, %c0_34] : memref<48x128xf32, #tpu.memory_space<vmem>>, vector<1x128xf32>
    %126 = vector.broadcast %125 : vector<1x128xf32> to vector<13x128xf32>
    %127 = arith.mulf %126, %124 : vector<13x128xf32>
    %128 = arith.addf %112, %127 : vector<13x128xf32>
    %c18 = arith.constant 18 : index
    %c0_35 = arith.constant 0 : index
    %129 = vector.load %arg3[%c18, %c0_35] : memref<48x128xf32, #tpu.memory_space<vmem>>, vector<1x128xf32>
    %130 = vector.broadcast %129 : vector<1x128xf32> to vector<13x128xf32>
    %131 = arith.mulf %130, %123 : vector<13x128xf32>
    %132 = arith.addf %116, %131 : vector<13x128xf32>
    %c34 = arith.constant 34 : index
    %c0_36 = arith.constant 0 : index
    %133 = vector.load %arg3[%c34, %c0_36] : memref<48x128xf32, #tpu.memory_space<vmem>>, vector<1x128xf32>
    %134 = vector.broadcast %133 : vector<1x128xf32> to vector<13x128xf32>
    %135 = arith.mulf %134, %124 : vector<13x128xf32>
    %136 = arith.addf %120, %135 : vector<13x128xf32>
    %137 = vector.extract_strided_slice %121 {offsets = [1, 0], sizes = [13, 128], strides = [1, 1]} : vector<16x128xf32> to vector<13x128xf32>
    %138 = vector.extract_strided_slice %122 {offsets = [1, 0], sizes = [13, 128], strides = [1, 1]} : vector<16x128xf32> to vector<13x128xf32>
    %c6 = arith.constant 6 : index
    %c0_37 = arith.constant 0 : index
    %139 = vector.load %arg3[%c6, %c0_37] : memref<48x128xf32, #tpu.memory_space<vmem>>, vector<1x128xf32>
    %140 = vector.broadcast %139 : vector<1x128xf32> to vector<13x128xf32>
    %141 = arith.mulf %140, %138 : vector<13x128xf32>
    %142 = arith.addf %128, %141 : vector<13x128xf32>
    %c22 = arith.constant 22 : index
    %c0_38 = arith.constant 0 : index
    %143 = vector.load %arg3[%c22, %c0_38] : memref<48x128xf32, #tpu.memory_space<vmem>>, vector<1x128xf32>
    %144 = vector.broadcast %143 : vector<1x128xf32> to vector<13x128xf32>
    %145 = arith.mulf %144, %137 : vector<13x128xf32>
    %146 = arith.addf %132, %145 : vector<13x128xf32>
    %c38 = arith.constant 38 : index
    %c0_39 = arith.constant 0 : index
    %147 = vector.load %arg3[%c38, %c0_39] : memref<48x128xf32, #tpu.memory_space<vmem>>, vector<1x128xf32>
    %148 = vector.broadcast %147 : vector<1x128xf32> to vector<13x128xf32>
    %149 = arith.mulf %148, %138 : vector<13x128xf32>
    %150 = arith.addf %136, %149 : vector<13x128xf32>
    %151 = vector.extract_strided_slice %121 {offsets = [2, 0], sizes = [13, 128], strides = [1, 1]} : vector<16x128xf32> to vector<13x128xf32>
    %152 = vector.extract_strided_slice %122 {offsets = [2, 0], sizes = [13, 128], strides = [1, 1]} : vector<16x128xf32> to vector<13x128xf32>
    %c10 = arith.constant 10 : index
    %c0_40 = arith.constant 0 : index
    %153 = vector.load %arg3[%c10, %c0_40] : memref<48x128xf32, #tpu.memory_space<vmem>>, vector<1x128xf32>
    %154 = vector.broadcast %153 : vector<1x128xf32> to vector<13x128xf32>
    %155 = arith.mulf %154, %152 : vector<13x128xf32>
    %156 = arith.addf %142, %155 : vector<13x128xf32>
    %c26 = arith.constant 26 : index
    %c0_41 = arith.constant 0 : index
    %157 = vector.load %arg3[%c26, %c0_41] : memref<48x128xf32, #tpu.memory_space<vmem>>, vector<1x128xf32>
    %158 = vector.broadcast %157 : vector<1x128xf32> to vector<13x128xf32>
    %159 = arith.mulf %158, %151 : vector<13x128xf32>
    %160 = arith.addf %146, %159 : vector<13x128xf32>
    %c42 = arith.constant 42 : index
    %c0_42 = arith.constant 0 : index
    %161 = vector.load %arg3[%c42, %c0_42] : memref<48x128xf32, #tpu.memory_space<vmem>>, vector<1x128xf32>
    %162 = vector.broadcast %161 : vector<1x128xf32> to vector<13x128xf32>
    %163 = arith.mulf %162, %152 : vector<13x128xf32>
    %164 = arith.addf %150, %163 : vector<13x128xf32>
    %165 = vector.extract_strided_slice %121 {offsets = [3, 0], sizes = [13, 128], strides = [1, 1]} : vector<16x128xf32> to vector<13x128xf32>
    %166 = vector.extract_strided_slice %122 {offsets = [3, 0], sizes = [13, 128], strides = [1, 1]} : vector<16x128xf32> to vector<13x128xf32>
    %c14 = arith.constant 14 : index
    %c0_43 = arith.constant 0 : index
    %167 = vector.load %arg3[%c14, %c0_43] : memref<48x128xf32, #tpu.memory_space<vmem>>, vector<1x128xf32>
    %168 = vector.broadcast %167 : vector<1x128xf32> to vector<13x128xf32>
    %169 = arith.mulf %168, %166 : vector<13x128xf32>
    %170 = arith.addf %156, %169 : vector<13x128xf32>
    %c30 = arith.constant 30 : index
    %c0_44 = arith.constant 0 : index
    %171 = vector.load %arg3[%c30, %c0_44] : memref<48x128xf32, #tpu.memory_space<vmem>>, vector<1x128xf32>
    %172 = vector.broadcast %171 : vector<1x128xf32> to vector<13x128xf32>
    %173 = arith.mulf %172, %165 : vector<13x128xf32>
    %174 = arith.addf %160, %173 : vector<13x128xf32>
    %c46 = arith.constant 46 : index
    %c0_45 = arith.constant 0 : index
    %175 = vector.load %arg3[%c46, %c0_45] : memref<48x128xf32, #tpu.memory_space<vmem>>, vector<1x128xf32>
    %176 = vector.broadcast %175 : vector<1x128xf32> to vector<13x128xf32>
    %177 = arith.mulf %176, %166 : vector<13x128xf32>
    %178 = arith.addf %164, %177 : vector<13x128xf32>
    %c125_i32 = arith.constant 125 : i32
    %179 = tpu.dynamic_rotate %1 by %c125_i32 dim 1 : vector<16x128xf32>, i32 -> vector<16x128xf32>
    %c125_i32_46 = arith.constant 125 : i32
    %180 = tpu.dynamic_rotate %3 by %c125_i32_46 dim 1 : vector<16x128xf32>, i32 -> vector<16x128xf32>
    %181 = vector.extract_strided_slice %179 {offsets = [0, 0], sizes = [13, 128], strides = [1, 1]} : vector<16x128xf32> to vector<13x128xf32>
    %182 = vector.extract_strided_slice %180 {offsets = [0, 0], sizes = [13, 128], strides = [1, 1]} : vector<16x128xf32> to vector<13x128xf32>
    %c3 = arith.constant 3 : index
    %c0_47 = arith.constant 0 : index
    %183 = vector.load %arg3[%c3, %c0_47] : memref<48x128xf32, #tpu.memory_space<vmem>>, vector<1x128xf32>
    %184 = vector.broadcast %183 : vector<1x128xf32> to vector<13x128xf32>
    %185 = arith.mulf %184, %182 : vector<13x128xf32>
    %186 = arith.addf %170, %185 : vector<13x128xf32>
    %c19 = arith.constant 19 : index
    %c0_48 = arith.constant 0 : index
    %187 = vector.load %arg3[%c19, %c0_48] : memref<48x128xf32, #tpu.memory_space<vmem>>, vector<1x128xf32>
    %188 = vector.broadcast %187 : vector<1x128xf32> to vector<13x128xf32>
    %189 = arith.mulf %188, %181 : vector<13x128xf32>
    %190 = arith.addf %174, %189 : vector<13x128xf32>
    %c35 = arith.constant 35 : index
    %c0_49 = arith.constant 0 : index
    %191 = vector.load %arg3[%c35, %c0_49] : memref<48x128xf32, #tpu.memory_space<vmem>>, vector<1x128xf32>
    %192 = vector.broadcast %191 : vector<1x128xf32> to vector<13x128xf32>
    %193 = arith.mulf %192, %182 : vector<13x128xf32>
    %194 = arith.addf %178, %193 : vector<13x128xf32>
    %195 = vector.extract_strided_slice %179 {offsets = [1, 0], sizes = [13, 128], strides = [1, 1]} : vector<16x128xf32> to vector<13x128xf32>
    %196 = vector.extract_strided_slice %180 {offsets = [1, 0], sizes = [13, 128], strides = [1, 1]} : vector<16x128xf32> to vector<13x128xf32>
    %c7 = arith.constant 7 : index
    %c0_50 = arith.constant 0 : index
    %197 = vector.load %arg3[%c7, %c0_50] : memref<48x128xf32, #tpu.memory_space<vmem>>, vector<1x128xf32>
    %198 = vector.broadcast %197 : vector<1x128xf32> to vector<13x128xf32>
    %199 = arith.mulf %198, %196 : vector<13x128xf32>
    %200 = arith.addf %186, %199 : vector<13x128xf32>
    %c23 = arith.constant 23 : index
    %c0_51 = arith.constant 0 : index
    %201 = vector.load %arg3[%c23, %c0_51] : memref<48x128xf32, #tpu.memory_space<vmem>>, vector<1x128xf32>
    %202 = vector.broadcast %201 : vector<1x128xf32> to vector<13x128xf32>
    %203 = arith.mulf %202, %195 : vector<13x128xf32>
    %204 = arith.addf %190, %203 : vector<13x128xf32>
    %c39 = arith.constant 39 : index
    %c0_52 = arith.constant 0 : index
    %205 = vector.load %arg3[%c39, %c0_52] : memref<48x128xf32, #tpu.memory_space<vmem>>, vector<1x128xf32>
    %206 = vector.broadcast %205 : vector<1x128xf32> to vector<13x128xf32>
    %207 = arith.mulf %206, %196 : vector<13x128xf32>
    %208 = arith.addf %194, %207 : vector<13x128xf32>
    %209 = vector.extract_strided_slice %179 {offsets = [2, 0], sizes = [13, 128], strides = [1, 1]} : vector<16x128xf32> to vector<13x128xf32>
    %210 = vector.extract_strided_slice %180 {offsets = [2, 0], sizes = [13, 128], strides = [1, 1]} : vector<16x128xf32> to vector<13x128xf32>
    %c11 = arith.constant 11 : index
    %c0_53 = arith.constant 0 : index
    %211 = vector.load %arg3[%c11, %c0_53] : memref<48x128xf32, #tpu.memory_space<vmem>>, vector<1x128xf32>
    %212 = vector.broadcast %211 : vector<1x128xf32> to vector<13x128xf32>
    %213 = arith.mulf %212, %210 : vector<13x128xf32>
    %214 = arith.addf %200, %213 : vector<13x128xf32>
    %c27 = arith.constant 27 : index
    %c0_54 = arith.constant 0 : index
    %215 = vector.load %arg3[%c27, %c0_54] : memref<48x128xf32, #tpu.memory_space<vmem>>, vector<1x128xf32>
    %216 = vector.broadcast %215 : vector<1x128xf32> to vector<13x128xf32>
    %217 = arith.mulf %216, %209 : vector<13x128xf32>
    %218 = arith.addf %204, %217 : vector<13x128xf32>
    %c43 = arith.constant 43 : index
    %c0_55 = arith.constant 0 : index
    %219 = vector.load %arg3[%c43, %c0_55] : memref<48x128xf32, #tpu.memory_space<vmem>>, vector<1x128xf32>
    %220 = vector.broadcast %219 : vector<1x128xf32> to vector<13x128xf32>
    %221 = arith.mulf %220, %210 : vector<13x128xf32>
    %222 = arith.addf %208, %221 : vector<13x128xf32>
    %223 = vector.extract_strided_slice %179 {offsets = [3, 0], sizes = [13, 128], strides = [1, 1]} : vector<16x128xf32> to vector<13x128xf32>
    %224 = vector.extract_strided_slice %180 {offsets = [3, 0], sizes = [13, 128], strides = [1, 1]} : vector<16x128xf32> to vector<13x128xf32>
    %c15 = arith.constant 15 : index
    %c0_56 = arith.constant 0 : index
    %225 = vector.load %arg3[%c15, %c0_56] : memref<48x128xf32, #tpu.memory_space<vmem>>, vector<1x128xf32>
    %226 = vector.broadcast %225 : vector<1x128xf32> to vector<13x128xf32>
    %227 = arith.mulf %226, %224 : vector<13x128xf32>
    %228 = arith.addf %214, %227 : vector<13x128xf32>
    %c31 = arith.constant 31 : index
    %c0_57 = arith.constant 0 : index
    %229 = vector.load %arg3[%c31, %c0_57] : memref<48x128xf32, #tpu.memory_space<vmem>>, vector<1x128xf32>
    %230 = vector.broadcast %229 : vector<1x128xf32> to vector<13x128xf32>
    %231 = arith.mulf %230, %223 : vector<13x128xf32>
    %232 = arith.addf %218, %231 : vector<13x128xf32>
    %c47 = arith.constant 47 : index
    %c0_58 = arith.constant 0 : index
    %233 = vector.load %arg3[%c47, %c0_58] : memref<48x128xf32, #tpu.memory_space<vmem>>, vector<1x128xf32>
    %234 = vector.broadcast %233 : vector<1x128xf32> to vector<13x128xf32>
    %235 = arith.mulf %234, %224 : vector<13x128xf32>
    %236 = arith.addf %222, %235 : vector<13x128xf32>
    %cst_59 = arith.constant dense<0.000000e+00> : vector<128xf32>
    %237 = vector.multi_reduction <add>, %228, %cst_59 [0] : vector<13x128xf32> to vector<128xf32>
    %238 = vector.shape_cast %237 : vector<128xf32> to vector<1x128xf32>
    %239 = arith.mulf %228, %228 : vector<13x128xf32>
    %cst_60 = arith.constant dense<0.000000e+00> : vector<128xf32>
    %240 = vector.multi_reduction <add>, %239, %cst_60 [0] : vector<13x128xf32> to vector<128xf32>
    %241 = vector.shape_cast %240 : vector<128xf32> to vector<1x128xf32>
    %cst_61 = arith.constant dense<0.000000e+00> : vector<128xf32>
    %242 = vector.multi_reduction <add>, %232, %cst_61 [0] : vector<13x128xf32> to vector<128xf32>
    %243 = vector.shape_cast %242 : vector<128xf32> to vector<1x128xf32>
    %244 = arith.mulf %232, %232 : vector<13x128xf32>
    %cst_62 = arith.constant dense<0.000000e+00> : vector<128xf32>
    %245 = vector.multi_reduction <add>, %244, %cst_62 [0] : vector<13x128xf32> to vector<128xf32>
    %246 = vector.shape_cast %245 : vector<128xf32> to vector<1x128xf32>
    %cst_63 = arith.constant dense<0.000000e+00> : vector<128xf32>
    %247 = vector.multi_reduction <add>, %236, %cst_63 [0] : vector<13x128xf32> to vector<128xf32>
    %248 = vector.shape_cast %247 : vector<128xf32> to vector<1x128xf32>
    %249 = arith.mulf %236, %236 : vector<13x128xf32>
    %cst_64 = arith.constant dense<0.000000e+00> : vector<128xf32>
    %250 = vector.multi_reduction <add>, %249, %cst_64 [0] : vector<13x128xf32> to vector<128xf32>
    %251 = vector.shape_cast %250 : vector<128xf32> to vector<1x128xf32>
    %cst_65 = arith.constant 0.000000e+00 : f32
    %252 = vector.broadcast %cst_65 : f32 to vector<2x128xf32>
    %253 = tpu.concatenate %238, %241, %243, %246, %248, %251, %252 in 0 : vector<1x128xf32>, vector<1x128xf32>, vector<1x128xf32>, vector<1x128xf32>, vector<1x128xf32>, vector<1x128xf32>, vector<2x128xf32> -> vector<8x128xf32>
    %c0_66 = arith.constant 0 : index
    %c0_67 = arith.constant 0 : index
    %254 = vector.load %arg5[%c0_66, %c0_67] : memref<128x128xf32, #tpu.memory_space<vmem>>, vector<128x128xf32>
    %cst_68 = arith.constant dense<0.000000e+00> : vector<8x128xf32>
    %255 = tpu.matmul %253, %254, %cst_68 {dimension_numbers = #tpu.dot_dimension_numbers<[1], [0], [0], [1], [0, 0, 1, 1], [], []>} : vector<8x128xf32>, vector<128x128xf32>, vector<8x128xf32> -> vector<8x128xf32>
    %256 = vector.extract_strided_slice %255 {offsets = [0, 0], sizes = [1, 128], strides = [1, 1]} : vector<8x128xf32> to vector<1x128xf32>
    %cst_69 = arith.constant 5.917160e-03 : f32
    %257 = vector.broadcast %cst_69 : f32 to vector<1x128xf32>
    %258 = arith.mulf %256, %257 : vector<1x128xf32>
    %259 = vector.extract_strided_slice %255 {offsets = [1, 0], sizes = [1, 128], strides = [1, 1]} : vector<8x128xf32> to vector<1x128xf32>
    %cst_70 = arith.constant 5.917160e-03 : f32
    %260 = vector.broadcast %cst_70 : f32 to vector<1x128xf32>
    %261 = arith.mulf %259, %260 : vector<1x128xf32>
    %262 = arith.mulf %258, %258 : vector<1x128xf32>
    %263 = arith.subf %261, %262 : vector<1x128xf32>
    %c0_71 = arith.constant 0 : index
    %c0_72 = arith.constant 0 : index
    %264 = vector.load %arg4[%c0_71, %c0_72] : memref<6x128xf32, #tpu.memory_space<vmem>>, vector<1x128xf32>
    %c1_73 = arith.constant 1 : index
    %c0_74 = arith.constant 0 : index
    %265 = vector.load %arg4[%c1_73, %c0_74] : memref<6x128xf32, #tpu.memory_space<vmem>>, vector<1x128xf32>
    %266 = vector.broadcast %258 : vector<1x128xf32> to vector<13x128xf32>
    %267 = arith.subf %228, %266 : vector<13x128xf32>
    %cst_75 = arith.constant 9.99999974E-6 : f32
    %268 = vector.broadcast %cst_75 : f32 to vector<1x128xf32>
    %269 = arith.addf %263, %268 : vector<1x128xf32>
    %270 = math.rsqrt %269 : vector<1x128xf32>
    %271 = vector.broadcast %270 : vector<1x128xf32> to vector<13x128xf32>
    %272 = arith.mulf %267, %271 : vector<13x128xf32>
    %273 = vector.broadcast %264 : vector<1x128xf32> to vector<13x128xf32>
    %274 = arith.mulf %272, %273 : vector<13x128xf32>
    %275 = vector.broadcast %265 : vector<1x128xf32> to vector<13x128xf32>
    %276 = arith.addf %274, %275 : vector<13x128xf32>
    %277 = arith.negf %276 : vector<13x128xf32>
    %278 = math.exp %277 : vector<13x128xf32>
    %cst_76 = arith.constant 1.000000e+00 : f32
    %279 = vector.broadcast %cst_76 : f32 to vector<13x128xf32>
    %280 = arith.addf %279, %278 : vector<13x128xf32>
    %281 = arith.divf %279, %280 : vector<13x128xf32>
    %282 = vector.extract_strided_slice %255 {offsets = [2, 0], sizes = [1, 128], strides = [1, 1]} : vector<8x128xf32> to vector<1x128xf32>
    %cst_77 = arith.constant 5.917160e-03 : f32
    %283 = vector.broadcast %cst_77 : f32 to vector<1x128xf32>
    %284 = arith.mulf %282, %283 : vector<1x128xf32>
    %285 = vector.extract_strided_slice %255 {offsets = [3, 0], sizes = [1, 128], strides = [1, 1]} : vector<8x128xf32> to vector<1x128xf32>
    %cst_78 = arith.constant 5.917160e-03 : f32
    %286 = vector.broadcast %cst_78 : f32 to vector<1x128xf32>
    %287 = arith.mulf %285, %286 : vector<1x128xf32>
    %288 = arith.mulf %284, %284 : vector<1x128xf32>
    %289 = arith.subf %287, %288 : vector<1x128xf32>
    %c2_79 = arith.constant 2 : index
    %c0_80 = arith.constant 0 : index
    %290 = vector.load %arg4[%c2_79, %c0_80] : memref<6x128xf32, #tpu.memory_space<vmem>>, vector<1x128xf32>
    %c3_81 = arith.constant 3 : index
    %c0_82 = arith.constant 0 : index
    %291 = vector.load %arg4[%c3_81, %c0_82] : memref<6x128xf32, #tpu.memory_space<vmem>>, vector<1x128xf32>
    %292 = vector.broadcast %284 : vector<1x128xf32> to vector<13x128xf32>
    %293 = arith.subf %232, %292 : vector<13x128xf32>
    %cst_83 = arith.constant 9.99999974E-6 : f32
    %294 = vector.broadcast %cst_83 : f32 to vector<1x128xf32>
    %295 = arith.addf %289, %294 : vector<1x128xf32>
    %296 = math.rsqrt %295 : vector<1x128xf32>
    %297 = vector.broadcast %296 : vector<1x128xf32> to vector<13x128xf32>
    %298 = arith.mulf %293, %297 : vector<13x128xf32>
    %299 = vector.broadcast %290 : vector<1x128xf32> to vector<13x128xf32>
    %300 = arith.mulf %298, %299 : vector<13x128xf32>
    %301 = vector.broadcast %291 : vector<1x128xf32> to vector<13x128xf32>
    %302 = arith.addf %300, %301 : vector<13x128xf32>
    %303 = vector.extract_strided_slice %255 {offsets = [4, 0], sizes = [1, 128], strides = [1, 1]} : vector<8x128xf32> to vector<1x128xf32>
    %cst_84 = arith.constant 5.917160e-03 : f32
    %304 = vector.broadcast %cst_84 : f32 to vector<1x128xf32>
    %305 = arith.mulf %303, %304 : vector<1x128xf32>
    %306 = vector.extract_strided_slice %255 {offsets = [5, 0], sizes = [1, 128], strides = [1, 1]} : vector<8x128xf32> to vector<1x128xf32>
    %cst_85 = arith.constant 5.917160e-03 : f32
    %307 = vector.broadcast %cst_85 : f32 to vector<1x128xf32>
    %308 = arith.mulf %306, %307 : vector<1x128xf32>
    %309 = arith.mulf %305, %305 : vector<1x128xf32>
    %310 = arith.subf %308, %309 : vector<1x128xf32>
    %c4_86 = arith.constant 4 : index
    %c0_87 = arith.constant 0 : index
    %311 = vector.load %arg4[%c4_86, %c0_87] : memref<6x128xf32, #tpu.memory_space<vmem>>, vector<1x128xf32>
    %c5_88 = arith.constant 5 : index
    %c0_89 = arith.constant 0 : index
    %312 = vector.load %arg4[%c5_88, %c0_89] : memref<6x128xf32, #tpu.memory_space<vmem>>, vector<1x128xf32>
    %313 = vector.broadcast %305 : vector<1x128xf32> to vector<13x128xf32>
    %314 = arith.subf %236, %313 : vector<13x128xf32>
    %cst_90 = arith.constant 9.99999974E-6 : f32
    %315 = vector.broadcast %cst_90 : f32 to vector<1x128xf32>
    %316 = arith.addf %310, %315 : vector<1x128xf32>
    %317 = math.rsqrt %316 : vector<1x128xf32>
    %318 = vector.broadcast %317 : vector<1x128xf32> to vector<13x128xf32>
    %319 = arith.mulf %314, %318 : vector<13x128xf32>
    %320 = vector.broadcast %311 : vector<1x128xf32> to vector<13x128xf32>
    %321 = arith.mulf %319, %320 : vector<13x128xf32>
    %322 = vector.broadcast %312 : vector<1x128xf32> to vector<13x128xf32>
    %323 = arith.addf %321, %322 : vector<13x128xf32>
    %324 = arith.mulf %281, %302 : vector<13x128xf32>
    %325 = arith.addf %324, %323 : vector<13x128xf32>
    %c0_91 = arith.constant 0 : index
    %c0_92 = arith.constant 0 : index
    %c0_93 = arith.constant 0 : index
    %326 = vector.load %arg6[%c0_91, %c0_92, %c0_93] : memref<1x13x128xf32, #tpu.memory_space<vmem>>, vector<1x13x128xf32>
    %327 = vector.shape_cast %326 : vector<1x13x128xf32> to vector<13x128xf32>
    %328 = vector.shape_cast %325 : vector<13x128xf32> to vector<1x13x128xf32>
    tpu.vector_store %arg6[%c0_91, %c0_92, %c0_93], %328 {strides = array<i32>} : memref<1x13x128xf32, #tpu.memory_space<vmem>>, vector<1x13x128xf32>,
    return
  }
  func.func @transform_0(%arg0: i32) -> (i32, i32, i32) {
    %c0_i32 = arith.constant 0 : i32
    %c0_i32_0 = arith.constant 0 : i32
    %c0_i32_1 = arith.constant 0 : i32
    return %arg0, %c0_i32, %c0_i32_0 : i32, i32, i32
  }
  func.func @transform_1(%arg0: i32) -> (i32, i32, i32) {
    %c0_i32 = arith.constant 0 : i32
    %c0_i32_0 = arith.constant 0 : i32
    %c0_i32_1 = arith.constant 0 : i32
    return %arg0, %c0_i32, %c0_i32_0 : i32, i32, i32
  }
  func.func @transform_2(%arg0: i32) -> (i32, i32) {
    %c0_i32 = arith.constant 0 : i32
    %c0_i32_0 = arith.constant 0 : i32
    %c0_i32_1 = arith.constant 0 : i32
    return %c0_i32, %c0_i32_0 : i32, i32
  }
  func.func @transform_3(%arg0: i32) -> (i32, i32) {
    %c0_i32 = arith.constant 0 : i32
    %c0_i32_0 = arith.constant 0 : i32
    %c0_i32_1 = arith.constant 0 : i32
    return %c0_i32, %c0_i32_0 : i32, i32
  }
  func.func @transform_4(%arg0: i32) -> (i32, i32) {
    %c0_i32 = arith.constant 0 : i32
    %c0_i32_0 = arith.constant 0 : i32
    %c0_i32_1 = arith.constant 0 : i32
    return %c0_i32, %c0_i32_0 : i32, i32
  }
  func.func @transform_5(%arg0: i32) -> (i32, i32, i32) {
    %c0_i32 = arith.constant 0 : i32
    %c0_i32_0 = arith.constant 0 : i32
    %c0_i32_1 = arith.constant 0 : i32
    return %arg0, %c0_i32, %c0_i32_0 : i32, i32, i32
  }
}

</mosaic_0001>

<bundles_post_ra>
// kernel: tpu_custom_call.1
= control target key start
LH: loop header
LB: loop body
LE: loop exit
PB: predicated region body
PF: predicated region fallthrough
CT: control target
= control target key end

     0   :  { %s2340_s0 = inlined_call_operand.hbm [shape: f32[2,16,128], index: 0, kind: input, shape index: {}]   ;;  %s2341_s1 = inlined_call_operand.hbm [shape: f32[2,16,128], index: 1, kind: input, shape index: {}]   ;;  %s2342_s2 = inlined_call_operand.hbm [shape: f32[48,128], index: 2, kind: input, shape index: {}]   ;;  %s2343_s3 = inlined_call_operand.vmem [shape: f32[6,128], index: 3, kind: input, shape index: {}]   ;;  %s2344_s4 = inlined_call_operand.hbm [shape: f32[128,128], index: 4, kind: input, shape index: {}]   ;;  %s2345_s5 = inlined_call_operand.vmem [shape: f32[2,13,128], index: 5, kind: output, shape index: {}]  }
   0x1   :  { %2351 = sst [smem:[#allocation13_spill]] %s2340_s0 }
   0x2   :  { %10 = vsyncpa [#allocation3], 0 }
   0x3   :  { %12 = vsyncpa [#allocation3 + $0x1], 0 }
   0x4   :  { %13 = vsyncpa [#allocation5], 0 }
   0x5   :  { %15 = vsyncpa [#allocation5 + $0x1], 0 }
   0x6   :  { %16 = vsyncpa [#allocation8], 0  ;;  %s1837_s18 = smov 0   ;;  %s1839_s19 = smov 0  }
   0x7   :  { %s1841_s20 = smov 0   ;;  %s1843_s21 = smov 0  }
   0x8 LB: > { %s1856_s22 = sadd.s32 4294967295, %s1793_s21   ;;  %p42_p0 = scmp.ne.s32.totalorder %s1785_s19, %s1781_s18  ;;  %s1793_s21 = sphi %s1843_s21, %s2367_s21   ;;  %s1789_s20 = sphi %s1841_s20, %s2366_s20   ;;  %s1785_s19 = sphi %s1839_s19, %s2365_s19   ;;  %s1781_s18 = sphi %s1837_s18, %s2364_s18  }
   0x9   : > { %p2346_p1 = scmp.eq.s32.totalorder %s1856_s22, 0  ;;  %p1393_p2 = scmp.ge.s32.totalorder %s1793_s21, 1 }
   0xa   : > { %p168_p3 = scmp.lt.s32.totalorder %s1793_s21, 3  ;;  %s1795_s25 = smov [#allocation6]  }
   0xb   : > { %p1864_p4 = por %p2346_p1, %p42_p0  ;;  %s180_s26 = sshll.u32 %s1795_s25, 4  ;;  %s181_s26 = int_to_ptr.vmem [resolvable:$true] %s180_s26 }
   0xc   : > { %p1868_p5 = pnand %p1393_p2, %p168_p3  ;;  %s1796_s28 = smov [#allocation7]  }
   0xd   : > { %s2352_s23 = scalar_select %p1864_p4, 1, 0 }
   0xe   : > { %s2353_s24 = scalar_select %p1868_p5, 1, 0 }
   0xf   : > { %p1560_p6 = pneg %p1868_p5  ;;  %s196_s29 = sshll.u32 %s1796_s28, 4  ;;  %s1880_s29 = int_to_ptr.vmem [resolvable:$true] %s196_s29 }
  0x10   : > { %s1631_s7 = scalar_lea.hbm %s2342_s2, 768 }
  0x11   : > { %p1876_p7 = pnand %p1560_p6, %p2346_p1  ;;  %p1632_p8 = scmp.ne.s32.totalorder %s2342_s2, %s1631_s7 }
  0x12   : > { %p1638_p12 = scmp.lt.u32.totalorder %s1631_s7, %s2342_s2 }
  0x13   : > { %p1633_p9 = pneg %p1876_p7 }
  0x15   : > { %p1634_p10 = pnand %p1633_p9, %p1632_p8 }
  0x17   : > { %p1635_p11 = pneg %p1634_p10 }
  0x19   : > { %p1640_p13 = pnand %p1638_p12, %p1635_p11 }
  0x1b   : > { %1643 = shalt.err (!%p1640_p13)
}
  0x1c   : > { %s1644_s12 = scalar_lea.vmem %s181_s26, 768  ;;  %p1652_p6 = scmp.lt.s32.totalorder %s181_s26, %s181_s26 }
  0x1d   : > { %p1645_p0 = scmp.ne.s32.totalorder %s181_s26, %s1644_s12  ;;  %p1653_p1 = scmp.lt.s32.totalorder %s1644_s12, %s1644_s12 }
  0x1f   : > { %p1647_p2 = pnand %p1645_p0, %p1633_p9  ;;  %p1654_p4 = por %p1653_p1, %p1652_p6 }
  0x21   : > { %p1648_p3 = pneg %p1647_p2 }
  0x23   : > { %p1655_p5 = pnand %p1654_p4, %p1648_p3 }
  0x25   : > { %1658 = shalt.err (!%p1655_p5)
}
  0x26   : > { %s2349_s13 = smov 128   ;;  %s1798_s14 = smov 8  }
  0x27   : > { %1563 = dma.hbm_to_vmem [thread:$0]  (!%p1876_p7), %s2342_s2, 768, %s181_s26, [#allocation5], %s2349_s13, %s2349_s13, %s1798_s14  }
  0x28   : > { %s1659_s25 = scalar_lea.hbm %s2344_s4, 2048 }
  0x29   : > { %p1660_p1 = scmp.ne.s32.totalorder %s2344_s4, %s1659_s25  ;;  %p1666_p8 = scmp.lt.u32.totalorder %s1659_s25, %s2344_s4 }
  0x2b   : > { %p1662_p4 = pnand %p1660_p1, %p1633_p9 }
  0x2d   : > { %p1663_p5 = pneg %p1662_p4 }
  0x2f   : > { %p1668_p10 = pnand %p1666_p8, %p1663_p5 }
  0x31   : > { %1671 = shalt.err (!%p1668_p10)
}
  0x32   : > { %s1672_s26 = scalar_lea.vmem %s1880_s29, 2048  ;;  %p1680_p0 = scmp.lt.s32.totalorder %s1880_s29, %s1880_s29 }
  0x33   : > { %p1673_p11 = scmp.ne.s32.totalorder %s1880_s29, %s1672_s26  ;;  %p1681_p2 = scmp.lt.s32.totalorder %s1672_s26, %s1672_s26 }
  0x35   : > { %p1675_p12 = pnand %p1673_p11, %p1633_p9  ;;  %p1682_p3 = por %p1681_p2, %p1680_p0 }
  0x37   : > { %p1676_p13 = pneg %p1675_p12 }
  0x39   : > { %p1683_p6 = pnand %p1682_p3, %p1676_p13 }
  0x3b   : > { %1686 = shalt.err (!%p1683_p6)
}
  0x3c   : > { %1566 = dma.hbm_to_vmem [thread:$0]  (!%p1876_p7), %s2344_s4, 2048, %s1880_s29, [#allocation8], %s2349_s13, %s2349_s13, %s1798_s14  }
  0x3d   : > { %s1936_s10 = sadd.s32 1, %s1793_s21   ;;  %s29_s27 = sadd.s32 1, %s1789_s20 }
  0x3e   : > { %s26_s11 = ssub.s32 %s1793_s21, %s1936_s10  ;;  %p36_p9 = scmp.ne.s32.totalorder %s1789_s20, %s1785_s19 }
  0x3f   : > { %p27_p1 = scmp.eq.s32.totalorder %s26_s11, 0  ;;  %p37_p4 = scmp.eq.s32.totalorder %s1793_s21, 0 }
  0x40   : > { %p1576_p5 = scmp.lt.s32.totalorder %s1793_s21, 2  ;;  %s210_s12 = sand.u32 1, %s1789_s20  }
  0x41   : > { %s1947_s15 = scalar_select %p27_p1, %s1789_s20, %s29_s27  }
  0x42   : > { %p38_p8 = por %p37_p4, %p36_p9  ;;  %s1949_s16 = sshll.u32 %s210_s12, 4 }
  0x43   : > { %s1469_s17 = sshll.u32 %s1793_s21, 8  ;;  %s2355_s0 = sld [smem:[#allocation13_spill]] }
  0x44   : > { %s214_s28 = scalar_lea.vmem [#allocation2], %s1949_s16  ;;  %p1958_p7 = pnand %p1576_p5, %p38_p8 }
  0x45   : > { %s221_s30 = sshll.u32 %s214_s28, 4  ;;  %s1967_s8 = scalar_lea.hbm %s2341_s1, %s1469_s17  ;;  %s1962_s30 = int_to_ptr.vmem [resolvable:$true] %s221_s30 }
  0x46   : > { %s1969_s9 = scalar_lea.sflag [#allocation3], %s210_s12  ;;  %p1689_p11 = pneg %p1958_p7 }
  0x49   : > { %s1955_s29 = scalar_lea.hbm %s2355_s0, %s1469_s17  ;;  %s1692_s25 = scalar_lea.hbm %s2355_s0, 512 }
  0x4a   : > { %s1687_s27 = scalar_lea.hbm %s1955_s29, 256  ;;  %p1693_p0 = scmp.lt.u32.totalorder %s1955_s29, %s2355_s0 }
  0x4b   : > { %p1688_p10 = scmp.ne.s32.totalorder %s1955_s29, %s1687_s27  ;;  %p1694_p2 = scmp.lt.u32.totalorder %s1692_s25, %s1687_s27 }
  0x4c   : > { %p1696_p6 = scmp.lt.u32.totalorder %s1687_s27, %s1955_s29 }
  0x4d   : > { %p1690_p12 = pnand %p1689_p11, %p1688_p10  ;;  %p1695_p3 = por %p1694_p2, %p1693_p0 }
  0x4f   : > { %p1691_p13 = pneg %p1690_p12  ;;  %p1697_p9 = por %p1696_p6, %p1695_p3 }
  0x51   : > { %p1698_p1 = pnand %p1697_p9, %p1691_p13 }
  0x53   : > { %1701 = shalt.err (!%p1698_p1)
}
  0x54   : > { %s1702_s12 = scalar_lea.vmem %s1962_s30, 256  ;;  %s1799_s17 = smov [#allocation2]  }
  0x55   : > { %p1703_p4 = scmp.ne.s32.totalorder %s1962_s30, %s1702_s12  ;;  %s1707_s7 = sshll.u32 %s1799_s17, 4  ;;  %s1708_s7 = int_to_ptr.vmem [resolvable:$false] %s1707_s7 }
  0x56   : > { %s1709_s13 = scalar_lea.vmem %s1708_s7, 512  ;;  %p1710_p10 = scmp.lt.s32.totalorder %s1962_s30, %s1708_s7 }
  0x57   : > { %p1705_p5 = pnand %p1703_p4, %p1689_p11  ;;  %p1711_p12 = scmp.lt.s32.totalorder %s1709_s13, %s1702_s12 }
  0x59   : > { %p1706_p8 = pneg %p1705_p5  ;;  %p1712_p0 = por %p1711_p12, %p1710_p10 }
  0x5b   : > { %p1713_p2 = pnand %p1712_p0, %p1706_p8 }
  0x5d   : > { %1716 = shalt.err (!%p1713_p2)
}
  0x5e   : > { %s2357_s26 = smov 128   ;;  %s235_s27 = scalar_lea.vmem [#allocation4], %s1949_s16 }
  0x5f   : > { %1570 = dma.hbm_to_vmem [thread:$0]  (!%p1958_p7), %s1955_s29, 256, %s1962_s30, %s1969_s9, %s2357_s26, %s2357_s26, %s1798_s14  }
  0x60   : > { %s242_s11 = sshll.u32 %s235_s27, 4  ;;  %s231_s18 = sand.u32 1, %s1793_s21   ;;  %s2002_s11 = int_to_ptr.vmem [resolvable:$true] %s242_s11 }
  0x61   : > { %s2004_s25 = scalar_lea.sflag [#allocation5], %s231_s18  ;;  %s1717_s28 = scalar_lea.hbm %s1967_s8, 256 }
  0x62   : > { %p1718_p13 = scmp.ne.s32.totalorder %s1967_s8, %s1717_s28  ;;  %s1722_s7 = scalar_lea.hbm %s2341_s1, 512 }
  0x63   : > { %p1723_p9 = scmp.lt.u32.totalorder %s1967_s8, %s2341_s1  ;;  %p1724_p1 = scmp.lt.u32.totalorder %s1722_s7, %s1717_s28 }
  0x64   : > { %p1720_p3 = pnand %p1718_p13, %p1689_p11  ;;  %p1726_p5 = scmp.lt.u32.totalorder %s1717_s28, %s1967_s8 }
  0x65   : > { %p1725_p4 = por %p1724_p1, %p1723_p9 }
  0x66   : > { %p1721_p6 = pneg %p1720_p3 }
  0x67   : > { %p1727_p8 = por %p1726_p5, %p1725_p4 }
  0x69   : > { %p1728_p10 = pnand %p1727_p8, %p1721_p6 }
  0x6b   : > { %1731 = shalt.err (!%p1728_p10)
}
  0x6c   : > { %s1732_s21 = scalar_lea.vmem %s2002_s11, 256  ;;  %s1800_s16 = smov [#allocation4]  }
  0x6d   : > { %p1733_p12 = scmp.ne.s32.totalorder %s2002_s11, %s1732_s21  ;;  %s1737_s29 = sshll.u32 %s1800_s16, 4  ;;  %s1738_s29 = int_to_ptr.vmem [resolvable:$false] %s1737_s29 }
  0x6e   : > { %s1739_s0 = scalar_lea.vmem %s1738_s29, 512  ;;  %p1740_p13 = scmp.lt.s32.totalorder %s2002_s11, %s1738_s29 }
  0x6f   : > { %p1735_p0 = pnand %p1733_p12, %p1689_p11  ;;  %p1741_p3 = scmp.lt.s32.totalorder %s1739_s0, %s1732_s21 }
  0x71   : > { %p1736_p2 = pneg %p1735_p0  ;;  %p1742_p9 = por %p1741_p3, %p1740_p13 }
  0x73   : > { %p1743_p1 = pnand %p1742_p9, %p1736_p2 }
  0x75   : > { %1746 = shalt.err (!%p1743_p1)
}
  0x76   : > { %1573 = dma.hbm_to_vmem [thread:$0]  (!%p1958_p7), %s1967_s8, 256, %s2002_s11, %s2004_s25, %s2357_s26, %s2357_s26, %s1798_s14  }
  0x77   : > { %p2358_p11 = scmp.ne.s32.totalorder %s2353_s24, 0 }
  0x78   : > { %s256_s30 = sand.u32 (!%p2358_p11), 1, %s1785_s19   ;;  %p2359_p6 = scmp.ne.s32.totalorder (!%p2358_p11), %s2352_s23, 0 }
  0x79   : > { %254 = sbr.rel (%p2358_p11) target bundleno = 609 (0x261), region = 40  ;;  %s1404_s9 = sshll.u32 (!%p2358_p11), %s256_s30, 4 }
  0x7a   : > { %s257_s27 = scalar_lea.sflag (!%p2358_p11), [#allocation3], %s256_s30  ;;  %s260_s18 = scalar_lea.vmem (!%p2358_p11), [#allocation2], %s1404_s9 }
  0x80   : > { %1764 = dma.done.wait (%p2359_p6), %s257_s27, 256  }
  0x81   : > { %1766 = vsyncadd (%p2359_p6), %s257_s27, 4294967040  ;;  %s265_s6 = sand.u32 1, %s1856_s22   ;;  %s269_s12 = scalar_lea.vmem [#allocation4], %s1404_s9 }
  0x82   : > { %s266_s28 = scalar_lea.sflag [#allocation5], %s265_s6 }
  0x83   : > { %1768 = dma.done.wait (%p2359_p6), %s266_s28, 256  }
  0x84   : > { %1770 = vsyncadd (%p2359_p6), %s266_s28, 4294967040  ;;  %p2360_p7 = scmp.eq.s32.totalorder %s1856_s22, 0 }
  0x86   : > { %1772 = dma.done.wait (%p2360_p7), [#allocation5], 768   ;;  %p2361_p4 = pmov %p2360_p7 }
  0x88   : > { %1774 = vsyncadd (%p2361_p4), [#allocation5], 4294966528  ;;  %p2362_p5 = pmov %p2361_p4 }
  0x89   : > { %p2363_p8 = pmov %p2361_p4 }
  0x8a   : > { %1776 = dma.done.wait (%p2362_p5), [#allocation8], 2048  }
  0x8b   : > { %1778 = vsyncadd (%p2363_p8), [#allocation8], 4294965248  ;;  %v2053_v0 = vld [vmem:[%s269_s12] sm:$0xff]  ;;  %v2057_v2 = vld [vmem:[%s269_s12 + $0x8] sm:$0xff]  ;;  %vm354_vm0 = vcmask 1046528   ;;  %vm403_vm1 = vcmask 1045504  }
  0x8c   : > { %v2055_v1 = vld [vmem:[%s260_s18] sm:$0xff]  ;;  %s1801_s23 = smov 127   ;;  %v2061_v3 = vld [vmem:[%s260_s18 + $0x8] sm:$0xff]  ;;  %vm452_vm2 = vcmask 1044480   ;;  %s1802_s24 = smov 126   ;;  %vm1805_vm3 = vmmov 0  }
  0x8d   : > { %496 = vrot.lane.b32.xlu0 %v2053_v0, %s1801_s23  ;;  %492 = vrot.lane.b32.xlu1 %v2055_v1, %s1801_s23  ;;  %v2063_v4 = vld [vmem:[#allocation6] ss:$0 sm:$0xff]  ;;  %v1413_v6 = vld [vmem:[#allocation6 + $0x4] ss:$0 sm:$0xff]  ;;  %v1416_v8 = vld [vmem:[#allocation6 + $0x8] ss:$0 sm:$0xff] }
  0x8e   : > { %v2065_v5 = vld [vmem:[#allocation6 + $0x20] ss:$0 sm:$0xff]  ;;  %v1415_v7 = vld [vmem:[#allocation6 + $0x24] ss:$0 sm:$0xff]  ;;  %v323_v9 = vmul.f32 %v2063_v4, %v2053_v0  ;;  %v2072_v11 = vmul.f32 %v1413_v6, %v2057_v2  ;;  %v2078_v13 = vmul.f32 %v1416_v8, %v2057_v2  ;;  %v1418_v14 = vld [vmem:[#allocation6 + $0x28] ss:$0 sm:$0xff]  ;;  %v350_v17 = vmul.f32 %v1413_v6, %v2053_v0 }
  0x8f   : > { %v341_v10 = vmul.f32 %v2065_v5, %v2053_v0  ;;  %v2075_v12 = vmul.f32 %v1415_v7, %v2057_v2  ;;  %v1419_v15 = vld [vmem:[#allocation6 + $0xc] ss:$0 sm:$0xff]  ;;  %v2082_v18 = vmul.f32 %v1418_v14, %v2057_v2  ;;  %v383_v21 = vmul.f32 %v1415_v7, %v2053_v0  ;;  %v2109_v37 = vld [vmem:[#allocation6 + $0x10] ss:$0 sm:$0xff]  ;;  %v1414_v38 = vld [vmem:[#allocation6 + $0x14] ss:$0 sm:$0xff] }
  0x90   : > { %v1421_v16 = vld [vmem:[#allocation6 + $0x2c] ss:$0 sm:$0xff]  ;;  %v2085_v19 = vmul.f32 %v1419_v15, %v2057_v2  ;;  %v356_v22 = vrot.slane %v2072_v11, 1  ;;  %v405_v24 = vrot.slane %v2078_v13, 2  ;;  %v355_v25 = vrot.slane %v350_v17, 1  ;;  %s1803_s14 = smov 125  }
  0x91   : > { %v2088_v20 = vmul.f32 %v1421_v16, %v2057_v2  ;;  %498 = vrot.lane.b32.xlu0 %v2057_v2, %s1801_s23  ;;  %494 = vrot.lane.b32.xlu1 %v2061_v3, %s1801_s23  ;;  %v388_v23 = vrot.slane %v2075_v12, 1  ;;  %v437_v26 = vrot.slane %v2082_v18, 2  ;;  %v387_v29 = vrot.slane %v383_v21, 1  ;;  %v1417_v39 = vld [vmem:[#allocation6 + $0x18] ss:$0 sm:$0xff]  ;;  %v1093_v17 = vld [vmem:[#allocation7] sm:$0xff] }
  0x92   : > { %v454_v27 = vrot.slane %v2085_v19, 3  ;;  %v357_v30 = vsel %vm354_vm0, %v355_v25, %v356_v22  ;;  %v399_v31 = vmul.f32 %v1416_v8, %v2053_v0  ;;  %v432_v32 = vmul.f32 %v1418_v14, %v2053_v0  ;;  %v1420_v44 = vld [vmem:[#allocation6 + $0x1c] ss:$0 sm:$0xff]  ;;  %v1427_v11 = vld [vmem:[#allocation6 + $0x25] ss:$0 sm:$0xff]  ;;  %p309_p10 = scmp.lt.s32.totalorder %s1856_s22, 1 }
  0x93   : > { %v486_v28 = vrot.slane %v2088_v20, 3  ;;  %v448_v33 = vmul.f32 %v1419_v15, %v2053_v0  ;;  %v360_v34 = vadd.f32 %v357_v30, %v323_v9  ;;  %v389_v35 = vsel %vm354_vm0, %v387_v29, %v388_v23  ;;  %v1094_v21 = vld [vmem:[#allocation7 + $0x8] sm:$0xff]  ;;  %v1095_v30 = vld [vmem:[#allocation7 + $0x10] sm:$0xff]  ;;  %v1431_v12 = vld [vmem:[#allocation6 + $0xd] ss:$0 sm:$0xff] }
  0x94   : > { %v481_v36 = vmul.f32 %v1421_v16, %v2053_v0  ;;  %v392_v40 = vadd.f32 %v389_v35, %v341_v10  ;;  %v404_v41 = vrot.slane %v399_v31, 2  ;;  %v436_v42 = vrot.slane %v432_v32, 2  ;;  %v1096_v31 = vld [vmem:[#allocation7 + $0x18] sm:$0xff]  ;;  %s2369_s22 = smov (!%p309_p10, %s1856_s22), 1 }
  0x95   : > { %675 = vrot.lane.b32.xlu0 %v2053_v0, %s1802_s24  ;;  %677 = vrot.lane.b32.xlu1 %v2057_v2, %s1802_s24  ;;  %v453_v43 = vrot.slane %v448_v33, 3  ;;  %v2114_v46 = vmul.f32 %v1414_v38, %v2061_v3  ;;  %v2117_v47 = vmul.f32 %v1417_v39, %v2061_v3  ;;  %v2120_v48 = vmul.f32 %v1420_v44, %v2061_v3  ;;  %v1097_v33 = vld [vmem:[#allocation7 + $0x20] sm:$0xff]  ;;  %s1471_s9 = sshll.u32 %s2369_s22, 4 }
  0x96   : > { %v485_v45 = vrot.slane %v481_v36, 3  ;;  %v406_v49 = vsel %vm403_vm1, %v404_v41, %v405_v24  ;;  %v438_v50 = vsel %vm403_vm1, %v436_v42, %v437_v26  ;;  %v332_v55 = vmul.f32 %v2109_v37, %v2055_v1  ;;  %v1100_v36 = vld [vmem:[#allocation7 + $0x38] sm:$0xff]  ;;  %v1103_v42 = vld [vmem:[#allocation7 + $0x50] sm:$0xff]  ;;  %s313_s6 = scalar_lea.vmem %s2345_s5, %s1471_s9 }
  0x97   : > { %v455_v51 = vsel %vm452_vm2, %v453_v43, %v454_v27  ;;  %v409_v52 = vadd.f32 %v406_v49, %v360_v34  ;;  %v441_v53 = vadd.f32 %v438_v50, %v392_v40  ;;  %v372_v56 = vrot.slane %v2114_v46, 1  ;;  %v1098_v34 = vld [vmem:[#allocation7 + $0x28] sm:$0xff]  ;;  %v1104_v43 = vld [vmem:[#allocation7 + $0x58] sm:$0xff] }
  0x98   : > { %v487_v54 = vsel %vm452_vm2, %v485_v45, %v486_v28  ;;  %v421_v57 = vrot.slane %v2117_v47, 2  ;;  %v367_v58 = vmul.f32 %v1414_v38, %v2055_v1  ;;  %v416_v59 = vmul.f32 %v1417_v39, %v2055_v1  ;;  %v1101_v39 = vld [vmem:[#allocation7 + $0x40] sm:$0xff]  ;;  %v1102_v40 = vld [vmem:[#allocation7 + $0x48] sm:$0xff] }
  0x99   : > { %671 = vrot.lane.b32.xlu0 %v2055_v1, %s1802_s24  ;;  %673 = vrot.lane.b32.xlu1 %v2061_v3, %s1802_s24  ;;  %v2142_v60 = vadd.f32 %v455_v51, %v409_v52  ;;  %v2144_v61 = vadd.f32 %v487_v54, %v441_v53  ;;  %v470_v62 = vrot.slane %v2120_v48, 3  ;;  %v465_v63 = vmul.f32 %v1420_v44, %v2055_v1  ;;  %v1105_v45 = vld [vmem:[#allocation7 + $0x60] sm:$0xff]  ;;  %v1106_v49 = vld [vmem:[#allocation7 + $0x68] sm:$0xff]  ;;  %v1107_v52 = vld [vmem:[#allocation7 + $0x70] sm:$0xff] }
  0x9a   : > { %v371_v6 = vrot.slane %v367_v58, 1  ;;  %v420_v7 = vrot.slane %v416_v59, 2  ;;  %v1525_v25 = vpack.c.bf16 %v1094_v21, %v1093_v17  ;;  %v1804_v29 = vmov 0.0|0.0   ;;  %v1108_v53 = vld [vmem:[#allocation7 + $0x78] sm:$0xff]  ;;  %v1426_v21 = vld [vmem:[#allocation6 + $0x15] ss:$0 sm:$0xff] }
  0x9b   : > { %v469_v8 = vrot.slane %v465_v63, 3  ;;  %1524 = vmatprep.subr.bf16.mxu0 %v1804_v29  ;;  %v1528_v32 = vpack.c.bf16 %v1096_v31, %v1095_v30  ;;  %v1531_v35 = vpack.c.bf16 %v1098_v34, %v1097_v33  ;;  %v1537_v41 = vpack.c.bf16 %v1102_v40, %v1101_v39 }
  0x9c   : > { %v373_v9 = vsel %vm354_vm0, %v371_v6, %v372_v56  ;;  %v422_v10 = vsel %vm403_vm1, %v420_v7, %v421_v57  ;;  %1526 = vmatpush3.bf16.msra.mxu0 %v1525_v25  ;;  %v1540_v44 = vpack.c.bf16 %v1104_v43, %v1103_v42  ;;  %v1806_v50 = vmov 0.0   ;;  %v1429_v25 = vld [vmem:[#allocation6 + $0x19] ss:$0 sm:$0xff] }
  0x9d   : > { %854 = vrot.lane.b32.xlu0 %v2053_v0, %s1803_s14  ;;  %856 = vrot.lane.b32.xlu1 %v2057_v2, %s1803_s14  ;;  %v376_v14 = vadd.f32 %v373_v9, %v332_v55  ;;  %v471_v15 = vsel %vm452_vm2, %v469_v8, %v470_v62  ;;  %v1543_v51 = vpack.c.bf16 %v1106_v49, %v1105_v45  ;;  %v1430_v9 = vld [vmem:[#allocation6 + $0x29] ss:$0 sm:$0xff]  ;;  %vm1083_vm4 = vcmask 1040384  }
  0x9e   : > { %1527 = vmatprep.subr.bf16.mxu0 %v1804_v29  ;;  %1521 = vmatprep.mubr.msk.f32.mxu0 %vm1805_vm3, %v1806_v50  ;;  %v1546_v54 = vpack.c.bf16 %v1108_v53, %v1107_v52  ;;  %v324_v55 = vmul.f32 %v2063_v4, %v2057_v2  ;;  %v342_v58 = vmul.f32 %v2065_v5, %v2057_v2  ;;  %v1422_v5 = vld [vmem:[#allocation6 + $0x1] ss:$0 sm:$0xff]  ;;  %vm1085_vm5 = vcmask 1041408  }
  0x9f   : > { %v425_v16 = vadd.f32 %v422_v10, %v376_v14  ;;  %v333_v59 = vmul.f32 %v2109_v37, %v2061_v3  ;;  %v1425_v37 = vld [vmem:[#allocation6 + $0x5] ss:$0 sm:$0xff]  ;;  %vm1087_vm6 = vcmask 1042432   ;;  %vm1089_vm7 = vcmask 1043456  }
  0xa0   : > { %1529 = vmatpush3.bf16.msra.mxu0 %v1528_v32  ;;  %v361_v63 = vadd.f32 %v356_v22, %v324_v55  ;;  %v393_v6 = vadd.f32 %v388_v23, %v342_v58  ;;  %v1428_v22 = vld [vmem:[#allocation6 + $0x9] ss:$0 sm:$0xff]  ;;  %v1433_v23 = vld [vmem:[#allocation6 + $0x2d] ss:$0 sm:$0xff] }
  0xa1   : > { %850 = vrot.lane.b32.xlu0 %v2055_v1, %s1803_s14  ;;  %852 = vrot.lane.b32.xlu1 %v2061_v3, %s1803_s14  ;;  %v2161_v0 = vadd.f32 %v471_v15, %v425_v16  ;;  %v1099_v1 = vld [vmem:[#allocation7 + $0x30] sm:$0xff]  ;;  %v377_v7 = vadd.f32 %v372_v56, %v333_v59 }
  0xa2   : > { %1530 = vmatprep.subr.bf16.mxu0 %v1804_v29  ;;  %v1534_v38 = vpack.c.bf16 %v1100_v36, %v1099_v1  ;;  %v410_v8 = vadd.f32 %v405_v24, %v361_v63  ;;  %v442_v4 = vadd.f32 %v437_v26, %v393_v6  ;;  %v1424_v3 = vld [vmem:[#allocation6 + $0x21] ss:$0 sm:$0xff] }
  0xa3   : > { %v426_v2 = vadd.f32 %v421_v57, %v377_v7  ;;  %v1423_v57 = vld [vmem:[#allocation6 + $0x11] ss:$0 sm:$0xff] }
  0xa4   : > { %1532 = vmatpush3.bf16.msra.mxu0 %v1531_v35  ;;  %v459_v46 = vadd.f32 %v454_v27, %v410_v8  ;;  %v491_v13 = vadd.f32 %v486_v28, %v442_v4 }
  0xa5   : > { %1533 = vmatprep.subr.bf16.mxu0 %v1804_v29  ;;  %v475_v18 = vadd.f32 %v470_v62, %v426_v2 }
  0xa8   : > { %1535 = vmatpush3.bf16.msra.mxu0 %v1534_v38 }
  0xa9   : > { %1536 = vmatprep.subr.bf16.mxu0 %v1804_v29 }
  0xac   : > { %1538 = vmatpush3.bf16.msra.mxu0 %v1537_v41 }
  0xad   : > { %1539 = vmatprep.subr.bf16.mxu0 %v1804_v29 }
  0xb0   : > { %1541 = vmatpush3.bf16.msra.mxu0 %v1540_v44 }
  0xb1   : > { %1542 = vmatprep.subr.bf16.mxu0 %v1804_v29 }
  0xb4   : > { %1544 = vmatpush3.bf16.msra.mxu0 %v1543_v51 }
  0xb5   : > { %1545 = vmatprep.subr.bf16.mxu0 %v1804_v29  ;;  %v1432_v29 = vld [vmem:[#allocation6 + $0x1d] ss:$0 sm:$0xff] }
  0xb8   : > { %1547 = vmatpush3.bf16.msra.mxu0 %v1546_v54 }
  0xff   : > { %v497_v10 = vpop.permute.xlu0 %496  ;;  %v493_v48 = vpop.permute.xlu1 %492 }
 0x100   : > { %v505_v24 = vmul.f32 %v1422_v5, %v497_v10  ;;  %v523_v26 = vmul.f32 %v1424_v3, %v497_v10  ;;  %v532_v47 = vmul.f32 %v1425_v37, %v497_v10  ;;  %v564_v56 = vmul.f32 %v1427_v11, %v497_v10 }
 0x101   : > { %v580_v14 = vmul.f32 %v1428_v22, %v497_v10  ;;  %v612_v15 = vmul.f32 %v1430_v9, %v497_v10  ;;  %v628_v16 = vmul.f32 %v1431_v12, %v497_v10  ;;  %v660_v17 = vmul.f32 %v1433_v23, %v497_v10 }
 0x102   : > { %v507_v19 = vadd.f32 %v505_v24, %v2142_v60  ;;  %v525_v20 = vadd.f32 %v523_v26, %v2144_v61  ;;  %v536_v27 = vrot.slane %v532_v47, 1  ;;  %v568_v28 = vrot.slane %v564_v56, 1  ;;  %v1434_v24 = vld [vmem:[#allocation6 + $0x2] ss:$0 sm:$0xff] }
 0x103   : > { %v584_v62 = vrot.slane %v580_v14, 2  ;;  %v616_v30 = vrot.slane %v612_v15, 2  ;;  %v632_v31 = vrot.slane %v628_v16, 3  ;;  %v664_v32 = vrot.slane %v660_v17, 3  ;;  %v499_v33 = vpop.permute.xlu0 %498  ;;  %v495_v55 = vpop.permute.xlu1 %494  ;;  %v1437_v15 = vld [vmem:[#allocation6 + $0x6] ss:$0 sm:$0xff] }
 0x104   : > { %v514_v34 = vmul.f32 %v1423_v57, %v493_v48  ;;  %v548_v35 = vmul.f32 %v1426_v21, %v493_v48  ;;  %v596_v1 = vmul.f32 %v1429_v25, %v493_v48  ;;  %v2189_v36 = vmul.f32 %v1432_v29, %v493_v48 }
 0x105   : > { %v506_v38 = vmul.f32 %v1422_v5, %v499_v33  ;;  %v524_v39 = vmul.f32 %v1424_v3, %v499_v33  ;;  %v533_v40 = vmul.f32 %v1425_v37, %v499_v33  ;;  %v565_v41 = vmul.f32 %v1427_v11, %v499_v33 }
 0x106   : > { %v516_v60 = vadd.f32 %v514_v34, %v2161_v0  ;;  %v552_v61 = vrot.slane %v548_v35, 1  ;;  %v600_v42 = vrot.slane %v596_v1, 2  ;;  %v648_v43 = vrot.slane %v2189_v36, 3  ;;  %v1445_v35 = vld [vmem:[#allocation6 + $0x2e] ss:$0 sm:$0xff] }
 0x107   : > { %v508_v44 = vadd.f32 %v506_v38, %v459_v46  ;;  %v526_v45 = vadd.f32 %v524_v39, %v491_v13  ;;  %v537_v49 = vrot.slane %v533_v40, 1  ;;  %v569_v50 = vrot.slane %v565_v41, 1 }
 0x108   : > { %v581_v51 = vmul.f32 %v1428_v22, %v499_v33  ;;  %v613_v52 = vmul.f32 %v1430_v9, %v499_v33  ;;  %v629_v53 = vmul.f32 %v1431_v12, %v499_v33  ;;  %v661_v54 = vmul.f32 %v1433_v23, %v499_v33 }
 0x109   : > { %v538_v58 = vsel %vm354_vm0, %v536_v27, %v537_v49  ;;  %v542_v59 = vadd.f32 %v537_v49, %v508_v44  ;;  %v570_v63 = vsel %vm354_vm0, %v568_v28, %v569_v50  ;;  %v574_v6 = vadd.f32 %v569_v50, %v526_v45  ;;  %v1442_v27 = vld [vmem:[#allocation6 + $0x2a] ss:$0 sm:$0xff]  ;;  %v1443_v28 = vld [vmem:[#allocation6 + $0xe] ss:$0 sm:$0xff] }
 0x10a   : > { %v541_v0 = vadd.f32 %v538_v58, %v507_v19  ;;  %v573_v7 = vadd.f32 %v570_v63, %v525_v20  ;;  %v585_v8 = vrot.slane %v581_v51, 2  ;;  %v617_v4 = vrot.slane %v613_v52, 2  ;;  %v1440_v20 = vld [vmem:[#allocation6 + $0xa] ss:$0 sm:$0xff] }
 0x10b   : > { %v633_v2 = vrot.slane %v629_v53, 3  ;;  %v665_v5 = vrot.slane %v661_v54, 3  ;;  %v515_v3 = vmul.f32 %v1423_v57, %v495_v55  ;;  %v549_v37 = vmul.f32 %v1426_v21, %v495_v55  ;;  %v1436_v57 = vld [vmem:[#allocation6 + $0x22] ss:$0 sm:$0xff] }
 0x10c   : > { %v586_v11 = vsel %vm403_vm1, %v584_v62, %v585_v8  ;;  %v590_v22 = vadd.f32 %v585_v8, %v542_v59  ;;  %v618_v9 = vsel %vm403_vm1, %v616_v30, %v617_v4  ;;  %v622_v12 = vadd.f32 %v617_v4, %v574_v6 }
 0x10d   : > { %v517_v23 = vadd.f32 %v515_v3, %v475_v18  ;;  %v553_v10 = vrot.slane %v549_v37, 1  ;;  %v597_v46 = vmul.f32 %v1429_v25, %v495_v55  ;;  %v2197_v13 = vmul.f32 %v1432_v29, %v495_v55  ;;  %v1439_v18 = vld [vmem:[#allocation6 + $0x26] ss:$0 sm:$0xff]  ;;  %v676_v25 = vpop.permute.xlu0 %675 }
 0x10e   : > { %v638_v26 = vadd.f32 %v633_v2, %v590_v22  ;;  %v670_v47 = vadd.f32 %v665_v5, %v622_v12  ;;  %v634_v56 = vsel %vm452_vm2, %v632_v31, %v633_v2  ;;  %v666_v14 = vsel %vm452_vm2, %v664_v32, %v665_v5 }
 0x10f   : > { %v554_v16 = vsel %vm354_vm0, %v552_v61, %v553_v10  ;;  %v558_v17 = vadd.f32 %v553_v10, %v517_v23  ;;  %v601_v21 = vrot.slane %v597_v46, 2  ;;  %v649_v19 = vrot.slane %v2197_v13, 3  ;;  %v1446_v13 = vld [vmem:[#allocation6 + $0x3] ss:$0 sm:$0xff] }
 0x110   : > { %v557_v29 = vadd.f32 %v554_v16, %v516_v60  ;;  %v589_v48 = vadd.f32 %v586_v11, %v541_v0  ;;  %v621_v62 = vadd.f32 %v618_v9, %v573_v7  ;;  %v684_v30 = vmul.f32 %v1434_v24, %v676_v25 }
 0x111   : > { %v602_v31 = vsel %vm403_vm1, %v600_v42, %v601_v21  ;;  %v606_v32 = vadd.f32 %v601_v21, %v558_v17  ;;  %v702_v33 = vmul.f32 %v1436_v57, %v676_v25  ;;  %v711_v34 = vmul.f32 %v1437_v15, %v676_v25  ;;  %v678_v42 = vpop.permute.xlu1 %677  ;;  %v1444_v21 = vld [vmem:[#allocation6 + $0x1e] ss:$0 sm:$0xff] }
 0x112   : > { %v637_v1 = vadd.f32 %v634_v56, %v589_v48  ;;  %v669_v38 = vadd.f32 %v666_v14, %v621_v62  ;;  %v743_v39 = vmul.f32 %v1439_v18, %v676_v25  ;;  %v759_v40 = vmul.f32 %v1440_v20, %v676_v25  ;;  %v1435_v56 = vld [vmem:[#allocation6 + $0x12] ss:$0 sm:$0xff]  ;;  %v1438_v14 = vld [vmem:[#allocation6 + $0x16] ss:$0 sm:$0xff] }
 0x113   : > { %v654_v41 = vadd.f32 %v649_v19, %v606_v32  ;;  %v715_v61 = vrot.slane %v711_v34, 1  ;;  %v791_v60 = vmul.f32 %v1442_v27, %v676_v25  ;;  %v2206_v44 = vmul.f32 %v1443_v28, %v676_v25 }
 0x114   : > { %v686_v45 = vadd.f32 %v684_v30, %v637_v1  ;;  %v704_v49 = vadd.f32 %v702_v33, %v669_v38  ;;  %v747_v50 = vrot.slane %v743_v39, 1  ;;  %v763_v51 = vrot.slane %v759_v40, 2 }
 0x115   : > { %v795_v52 = vrot.slane %v791_v60, 2  ;;  %v811_v53 = vrot.slane %v2206_v44, 3  ;;  %v2209_v54 = vmul.f32 %v1445_v35, %v676_v25  ;;  %v685_v55 = vmul.f32 %v1434_v24, %v678_v42  ;;  %v1449_v60 = vld [vmem:[#allocation6 + $0x7] ss:$0 sm:$0xff] }
 0x116   : > { %v703_v58 = vmul.f32 %v1436_v57, %v678_v42  ;;  %v712_v59 = vmul.f32 %v1437_v15, %v678_v42  ;;  %v744_v63 = vmul.f32 %v1439_v18, %v678_v42  ;;  %v760_v6 = vmul.f32 %v1440_v20, %v678_v42  ;;  %v1441_v57 = vld [vmem:[#allocation6 + $0x1a] ss:$0 sm:$0xff]  ;;  %v674_v18 = vpop.permute.xlu1 %673 }
 0x117   : > { %v843_v0 = vrot.slane %v2209_v54, 3  ;;  %v687_v7 = vadd.f32 %v685_v55, %v638_v26  ;;  %v792_v8 = vmul.f32 %v1442_v27, %v678_v42  ;;  %v808_v4 = vmul.f32 %v1443_v28, %v678_v42  ;;  %v672_v26 = vpop.permute.xlu0 %671 }
 0x118   : > { %v705_v2 = vadd.f32 %v703_v58, %v670_v47  ;;  %v716_v5 = vrot.slane %v712_v59, 1  ;;  %v748_v3 = vrot.slane %v744_v63, 1  ;;  %v764_v37 = vrot.slane %v760_v6, 2  ;;  %v1454_v58 = vld [vmem:[#allocation6 + $0x2b] ss:$0 sm:$0xff] }
 0x119   : > { %v796_v11 = vrot.slane %v792_v8, 2  ;;  %v812_v22 = vrot.slane %v808_v4, 3  ;;  %v840_v9 = vmul.f32 %v1445_v35, %v678_v42  ;;  %v605_v12 = vadd.f32 %v602_v31, %v557_v29  ;;  %v1455_v59 = vld [vmem:[#allocation6 + $0xf] ss:$0 sm:$0xff] }
 0x11a   : > { %v717_v23 = vsel %vm354_vm0, %v715_v61, %v716_v5  ;;  %v721_v10 = vadd.f32 %v716_v5, %v687_v7  ;;  %v749_v46 = vsel %vm354_vm0, %v747_v50, %v748_v3  ;;  %v753_v24 = vadd.f32 %v748_v3, %v705_v2  ;;  %v1448_v61 = vld [vmem:[#allocation6 + $0x23] ss:$0 sm:$0xff]  ;;  %v1452_v50 = vld [vmem:[#allocation6 + $0xb] ss:$0 sm:$0xff]  ;;  %v1457_v5 = vld [vmem:[#allocation6 + $0x2f] ss:$0 sm:$0xff] }
 0x11b   : > { %v720_v15 = vadd.f32 %v717_v23, %v686_v45  ;;  %v752_v16 = vadd.f32 %v749_v46, %v704_v49  ;;  %v765_v47 = vsel %vm403_vm1, %v763_v51, %v764_v37  ;;  %v797_v17 = vsel %vm403_vm1, %v795_v52, %v796_v11  ;;  %v1451_v49 = vld [vmem:[#allocation6 + $0x27] ss:$0 sm:$0xff]  ;;  %v855_v51 = vpop.permute.xlu0 %854 }
 0x11c   : > { %v769_v20 = vadd.f32 %v764_v37, %v721_v10  ;;  %v801_v25 = vadd.f32 %v796_v11, %v753_v24  ;;  %v844_v29 = vrot.slane %v840_v9, 3  ;;  %v650_v27 = vsel %vm452_vm2, %v648_v43, %v649_v19  ;;  %v857_v24 = vpop.permute.xlu1 %856 }
 0x11d   : > { %v653_v28 = vadd.f32 %v650_v27, %v605_v12  ;;  %v693_v48 = vmul.f32 %v1435_v56, %v672_v26  ;;  %v727_v62 = vmul.f32 %v1438_v14, %v672_v26  ;;  %v2221_v30 = vmul.f32 %v1441_v57, %v672_v26 }
 0x11e   : > { %v817_v31 = vadd.f32 %v812_v22, %v769_v20  ;;  %v849_v32 = vadd.f32 %v844_v29, %v801_v25  ;;  %v2223_v33 = vmul.f32 %v1444_v21, %v672_v26  ;;  %v694_v34 = vmul.f32 %v1435_v56, %v674_v18 }
 0x11f   : > { %v695_v35 = vadd.f32 %v693_v48, %v653_v28  ;;  %v731_v1 = vrot.slane %v727_v62, 1  ;;  %v779_v38 = vrot.slane %v2221_v30, 2  ;;  %v728_v39 = vmul.f32 %v1438_v14, %v674_v18 }
 0x120   : > { %v827_v36 = vrot.slane %v2223_v33, 3  ;;  %v696_v40 = vadd.f32 %v694_v34, %v654_v41  ;;  %v2227_v43 = vmul.f32 %v1441_v57, %v674_v18  ;;  %v2229_v19 = vmul.f32 %v1444_v21, %v674_v18 }
 0x121   : > { %v732_v45 = vrot.slane %v728_v39, 1  ;;  %v768_v42 = vadd.f32 %v765_v47, %v720_v15  ;;  %v800_v52 = vadd.f32 %v797_v17, %v752_v16  ;;  %v813_v54 = vsel %vm452_vm2, %v811_v53, %v812_v22 }
 0x122   : > { %v780_v55 = vrot.slane %v2227_v43, 2  ;;  %v828_v41 = vrot.slane %v2229_v19, 3  ;;  %v845_v63 = vsel %vm452_vm2, %v843_v0, %v844_v29  ;;  %v863_v6 = vmul.f32 %v1446_v13, %v855_v51 }
 0x123   : > { %v733_v7 = vsel %vm354_vm0, %v731_v1, %v732_v45  ;;  %v737_v8 = vadd.f32 %v732_v45, %v696_v40  ;;  %v816_v4 = vadd.f32 %v813_v54, %v768_v42  ;;  %v848_v2 = vadd.f32 %v845_v63, %v800_v52  ;;  %v1450_v45 = vld [vmem:[#allocation6 + $0x17] ss:$0 sm:$0xff]  ;;  %v1453_v42 = vld [vmem:[#allocation6 + $0x1b] ss:$0 sm:$0xff]  ;;  %v1456_v52 = vld [vmem:[#allocation6 + $0x1f] ss:$0 sm:$0xff]  ;;  %v853_v63 = vpop.permute.xlu1 %852 }
 0x124   : > { %v881_v3 = vmul.f32 %v1448_v61, %v855_v51  ;;  %v890_v37 = vmul.f32 %v1449_v60, %v855_v51  ;;  %v922_v44 = vmul.f32 %v1451_v49, %v855_v51  ;;  %v938_v11 = vmul.f32 %v1452_v50, %v855_v51 }
 0x125   : > { %v785_v53 = vadd.f32 %v780_v55, %v737_v8  ;;  %v865_v22 = vadd.f32 %v863_v6, %v816_v4  ;;  %v2238_v9 = vmul.f32 %v1454_v58, %v855_v51  ;;  %v986_v12 = vmul.f32 %v1455_v59, %v855_v51 }
 0x126   : > { %v883_v23 = vadd.f32 %v881_v3, %v848_v2  ;;  %v894_v10 = vrot.slane %v890_v37, 1  ;;  %v926_v46 = vrot.slane %v922_v44, 1  ;;  %v942_v0 = vrot.slane %v938_v11, 2 }
 0x127   : > { %v974_v56 = vrot.slane %v2238_v9, 2  ;;  %v990_v14 = vrot.slane %v986_v12, 3  ;;  %v1018_v57 = vmul.f32 %v1457_v5, %v855_v51  ;;  %v864_v26 = vmul.f32 %v1446_v13, %v857_v24 }
 0x128   : > { %v882_v15 = vmul.f32 %v1448_v61, %v857_v24  ;;  %v891_v16 = vmul.f32 %v1449_v60, %v857_v24  ;;  %v923_v47 = vmul.f32 %v1451_v49, %v857_v24  ;;  %v939_v17 = vmul.f32 %v1452_v50, %v857_v24  ;;  %v1447_v60 = vld [vmem:[#allocation6 + $0x13] ss:$0 sm:$0xff]  ;;  %v851_v49 = vpop.permute.xlu0 %850 }
 0x129   : > { %v1022_v21 = vrot.slane %v1018_v57, 3  ;;  %v866_v18 = vadd.f32 %v864_v26, %v817_v31  ;;  %v971_v20 = vmul.f32 %v1454_v58, %v857_v24  ;;  %v987_v25 = vmul.f32 %v1455_v59, %v857_v24 }
 0x12a   : > { %v884_v29 = vadd.f32 %v882_v15, %v849_v32  ;;  %v895_v27 = vrot.slane %v891_v16, 1  ;;  %v927_v28 = vrot.slane %v923_v47, 1  ;;  %v943_v48 = vrot.slane %v939_v17, 2 }
 0x12b   : > { %v975_v62 = vrot.slane %v971_v20, 2  ;;  %v991_v34 = vrot.slane %v987_v25, 3  ;;  %v1019_v1 = vmul.f32 %v1457_v5, %v857_v24  ;;  %v736_v39 = vadd.f32 %v733_v7, %v695_v35 }
 0x12c   : > { %v896_v40 = vsel %vm354_vm0, %v894_v10, %v895_v27  ;;  %v900_v43 = vadd.f32 %v895_v27, %v866_v18  ;;  %v928_v13 = vsel %vm354_vm0, %v926_v46, %v927_v28  ;;  %v932_v61 = vadd.f32 %v927_v28, %v884_v29 }
 0x12d   : > { %v899_v31 = vadd.f32 %v896_v40, %v865_v22  ;;  %v944_v50 = vsel %vm403_vm1, %v942_v0, %v943_v48  ;;  %v992_v32 = vsel %vm452_vm2, %v990_v14, %v991_v34  ;;  %v1023_v51 = vrot.slane %v1019_v1, 3 }
 0x12e   : > { %v948_v54 = vadd.f32 %v943_v48, %v900_v43  ;;  %v980_v58 = vadd.f32 %v975_v62, %v932_v61  ;;  %v781_v35 = vsel %vm403_vm1, %v779_v38, %v780_v55  ;;  %v829_v59 = vsel %vm452_vm2, %v827_v36, %v828_v41 }
 0x12f   : > { %v947_v6 = vadd.f32 %v944_v50, %v899_v31  ;;  %v784_v7 = vadd.f32 %v781_v35, %v736_v39  ;;  %v872_v8 = vmul.f32 %v1447_v60, %v851_v49  ;;  %v906_v4 = vmul.f32 %v1450_v45, %v851_v49 }
 0x130   : > { %v2253_v2 = vadd.f32 %v991_v34, %v948_v54  ;;  %v954_v5 = vmul.f32 %v1453_v42, %v851_v49  ;;  %v1002_v3 = vmul.f32 %v1456_v52, %v851_v49  ;;  %v833_v30 = vadd.f32 %v828_v41, %v785_v53 }
 0x131   : > { %v2257_v37 = vadd.f32 %v992_v32, %v947_v6  ;;  %v832_v38 = vadd.f32 %v829_v59, %v784_v7  ;;  %v910_v55 = vrot.slane %v906_v4, 1  ;;  %v873_v44 = vmul.f32 %v1447_v60, %v853_v63 }
 0x132   : > { %v958_v33 = vrot.slane %v954_v5, 2  ;;  %v1006_v11 = vrot.slane %v1002_v3, 3  ;;  %v907_v36 = vmul.f32 %v1450_v45, %v853_v63  ;;  %v955_v22 = vmul.f32 %v1453_v42, %v853_v63 }
 0x133   : > { %v874_v9 = vadd.f32 %v872_v8, %v832_v38  ;;  %v875_v12 = vadd.f32 %v873_v44, %v833_v30  ;;  %v1003_v10 = vmul.f32 %v1456_v52, %v853_v63  ;;  %v931_v46 = vadd.f32 %v928_v13, %v883_v23 }
 0x134   : > { %v911_v0 = vrot.slane %v907_v36, 1  ;;  %v959_v24 = vrot.slane %v955_v22, 2  ;;  %v976_v14 = vsel %vm403_vm1, %v974_v56, %v975_v62  ;;  %v1024_v19 = vsel %vm452_vm2, %v1022_v21, %v1023_v51 }
 0x135   : > { %v1007_v41 = vrot.slane %v1003_v10, 3  ;;  %v979_v53 = vadd.f32 %v976_v14, %v931_v46  ;;  %v2261_v57 = vadd.f32 %v1023_v51, %v980_v58  ;;  %v1029_v26 = vsel %vm452_vm2, %v2253_v2, 0.0 }
 0x136   : > { %v912_v15 = vsel %vm354_vm0, %v910_v55, %v911_v0  ;;  %v916_v16 = vadd.f32 %v911_v0, %v875_v12  ;;  %v960_v47 = vsel %vm403_vm1, %v958_v33, %v959_v24  ;;  %v1030_v23 = vadd.f32 %v1029_v26, %v2257_v37 }
 0x137   : > { %v915_v17 = vadd.f32 %v912_v15, %v874_v9  ;;  %v2268_v18 = vadd.f32 %v1024_v19, %v979_v53  ;;  %v1037_v56 = vmul.f32 %v2257_v37, %v2257_v37  ;;  %v1038_v25 = vmul.f32 %v2253_v2, %v2253_v2 }
 0x138   : > { %v964_v21 = vadd.f32 %v959_v24, %v916_v16  ;;  %v1031_v20 = vrot.slane %v1030_v23, 4  ;;  %v1065_v29 = vsel %vm452_vm2, %v2261_v57, 0.0  ;;  %v1074_v62 = vmul.f32 %v2261_v57, %v2261_v57 }
 0x139   : > { %v963_v27 = vadd.f32 %v960_v47, %v915_v17  ;;  %v1066_v28 = vadd.f32 %v1065_v29, %v2268_v18  ;;  %v1073_v48 = vmul.f32 %v2268_v18, %v2268_v18  ;;  %v1008_v34 = vsel %vm452_vm2, %v1006_v11, %v1007_v41 }
 0x13a   : > { %v2282_v1 = vadd.f32 %v1007_v41, %v964_v21  ;;  %v1032_v39 = vadd.f32 %v1031_v20, %v1030_v23  ;;  %v1039_v40 = vsel %vm452_vm2, %v1038_v25, 0.0  ;;  %v1075_v60 = vsel %vm452_vm2, %v1074_v62, 0.0 }
 0x13b   : > { %v2285_v43 = vadd.f32 %v1008_v34, %v963_v27  ;;  %v1040_v13 = vadd.f32 %v1039_v40, %v1037_v56  ;;  %v1067_v61 = vrot.slane %v1066_v28, 4  ;;  %v1076_v50 = vadd.f32 %v1075_v60, %v1073_v48 }
 0x13c   : > { %v1047_v45 = vsel %vm452_vm2, %v2282_v1, 0.0  ;;  %v1056_v49 = vmul.f32 %v2282_v1, %v2282_v1  ;;  %v1033_v31 = vrot.slane %v1032_v39, 2  ;;  %v1187_v48 = vlaneseq }
 0x13d   : > { %v1048_v32 = vadd.f32 %v1047_v45, %v2285_v43  ;;  %v1055_v51 = vmul.f32 %v2285_v43, %v2285_v43  ;;  %v1041_v42 = vrot.slane %v1040_v13, 4  ;;  %v1068_v52 = vadd.f32 %v1067_v61, %v1066_v28 }
 0x13e   : > { %v1057_v54 = vsel %vm452_vm2, %v1056_v49, 0.0  ;;  %v1077_v58 = vrot.slane %v1076_v50, 4  ;;  %v1034_v63 = vadd.f32 %v1033_v31, %v1032_v39  ;;  %v1188_v39 = vshrl.u32 %v1187_v48, 7 }
 0x13f   : > { %v1049_v35 = vrot.slane %v1048_v32, 4  ;;  %v1058_v59 = vadd.f32 %v1057_v54, %v1055_v51  ;;  %v1042_v6 = vadd.f32 %v1041_v42, %v1040_v13  ;;  %v1069_v7 = vrot.slane %v1068_v52, 2  ;;  %v1460_v42 = vld [vmem:[%s2343_s3 + $0x1] ss:$0 sm:$0xff] }
 0x140   : > { %v1078_v8 = vadd.f32 %v1077_v58, %v1076_v50  ;;  %v1035_v44 = vrot.slane %v1034_v63, 1  ;;  %v1189_v40 = vsub.s32 0, %v1188_v39  ;;  %v1197_v61 = vsub.s32 1, %v1188_v39  ;;  %v1459_v50 = vld [vmem:[%s2343_s3] ss:$0 sm:$0xff] }
 0x141   : > { %v1050_v4 = vadd.f32 %v1049_v35, %v1048_v32  ;;  %v1059_v5 = vrot.slane %v1058_v59, 4  ;;  %v1043_v3 = vrot.slane %v1042_v6, 2  ;;  %v1070_v11 = vadd.f32 %v1069_v7, %v1068_v52 }
 0x142   : > { %v1079_v30 = vrot.slane %v1078_v8, 2  ;;  %v1036_v10 = vadd.f32 %v1035_v44, %v1034_v63 }
 0x143   : > { %v1051_v38 = vrot.slane %v1050_v4, 2  ;;  %v1060_v55 = vadd.f32 %v1059_v5, %v1058_v59  ;;  %v1044_v33 = vadd.f32 %v1043_v3, %v1042_v6  ;;  %v1071_v14 = vrot.slane %v1070_v11, 1 }
 0x144   : > { %v1080_v12 = vadd.f32 %v1079_v30, %v1078_v8  ;;  %v1255_v6 = vsub.s32 4, %v1188_v39  ;;  %v1261_v8 = vsub.s32 5, %v1188_v39 }
 0x145   : > { %v1052_v36 = vadd.f32 %v1051_v38, %v1050_v4  ;;  %v1045_v22 = vrot.slane %v1044_v33, 1  ;;  %v1061_v9 = vrot.slane %v1060_v55, 2  ;;  %v1072_v47 = vadd.f32 %v1071_v14, %v1070_v11 }
 0x146   : > { %v1081_v53 = vrot.slane %v1080_v12, 1 }
 0x147   : > { %v1046_v46 = vadd.f32 %v1045_v22, %v1044_v33  ;;  %v1053_v0 = vrot.slane %v1052_v36, 1  ;;  %v1062_v24 = vadd.f32 %v1061_v9, %v1060_v55  ;;  %v1463_v9 = vld [vmem:[%s2343_s3 + $0x2] ss:$0 sm:$0xff] }
 0x148   : > { %v1082_v23 = vadd.f32 %v1081_v53, %v1080_v12 }
 0x149   : > { %v1054_v19 = vadd.f32 %v1053_v0, %v1052_v36  ;;  %v1063_v41 = vrot.slane %v1062_v24, 1  ;;  %v1084_v26 = vsel %vm1083_vm4, %v1036_v10, %v1046_v46 }
 0x14b   : > { %v1064_v15 = vadd.f32 %v1063_v41, %v1062_v24  ;;  %v1086_v16 = vsel %vm1085_vm5, %v1084_v26, %v1054_v19  ;;  %v1464_v24 = vld [vmem:[%s2343_s3 + $0x3] ss:$0 sm:$0xff]  ;;  %v1466_v19 = vld [vmem:[%s2343_s3 + $0x5] ss:$0 sm:$0xff] }
 0x14d   : > { %v1088_v17 = vsel %vm1087_vm6, %v1086_v16, %v1064_v15 }
 0x14e   : > { %v1090_v56 = vsel %vm1089_vm7, %v1088_v17, %v1072_v47 }
 0x14f   : > { %v1091_v21 = vsel %vm452_vm2, %v1090_v56, %v1082_v23 }
 0x150   : > { %1522 = vmatmul.mubr.msk.f32.vlgmr.msra.gmra.mrb[0].mxu0 %vm403_vm1, %v1091_v21 }
 0x223   : > { %v1175_v20 = vpop.f32.mrb[0].mxu0 }
 0x224   : > { %v1179_v25 = vmul.f32 0.00591716, %v1175_v20  ;;  %v1523_v29 = vpop.f32.mrb[1].mxu0 }
 0x226   : > { %v1180_v27 = vmul.f32 %v1179_v25, %v1179_v25  ;;  %v1190_v13 = vrot.slane %v1179_v25, %v1189_v40  ;;  %v1256_v3 = vrot.slane %v1179_v25, %v1255_v6 }
 0x228   : > { %v1182_v28 = vrot.slane %v1180_v27, 7  ;;  %v1191_v45 = vsub.f32 %v2257_v37, %v1190_v13  ;;  %v1192_v49 = vsub.f32 %v2253_v2, %v1190_v13  ;;  %v1229_v2 = vsub.s32 2, %v1188_v39 }
 0x229   : > { %v1235_v37 = vsub.s32 3, %v1188_v39  ;;  %v1257_v22 = vsub.f32 %v2268_v18, %v1256_v3  ;;  %v1258_v10 = vsub.f32 %v2261_v57, %v1256_v3 }
 0x22a   : > { %v1184_v62 = vsub.f32 %v1179_v25, %v1182_v28  ;;  %v1230_v7 = vrot.slane %v1179_v25, %v1229_v2 }
 0x22c   : > { %v1193_v34 = vadd.f32 1e-05, %v1184_v62  ;;  %v1231_v44 = vsub.f32 %v2285_v43, %v1230_v7  ;;  %v1232_v11 = vsub.f32 %v2282_v1, %v1230_v7  ;;  %v1465_v43 = vld [vmem:[%s2343_s3 + $0x4] ss:$0 sm:$0xff] }
 0x22e   : > { %1621 = vrsqrt.f32 %v1193_v34 }
 0x238   : > { %v1622_v60 = vpop.eup %1621 }
 0x239   : > { %v1198_v31 = vrot.slane %v1622_v60, %v1197_v61  ;;  %v1236_v5 = vrot.slane %v1622_v60, %v1235_v37  ;;  %v1262_v33 = vrot.slane %v1622_v60, %v1261_v8 }
 0x23b   : > { %v1199_v32 = vmul.f32 %v1198_v31, %v1191_v45  ;;  %v1200_v51 = vmul.f32 %v1198_v31, %v1192_v49  ;;  %v1237_v36 = vmul.f32 %v1236_v5, %v1231_v44  ;;  %v1238_v12 = vmul.f32 %v1236_v5, %v1232_v11 }
 0x23c   : > { %v1263_v46 = vmul.f32 %v1262_v33, %v1257_v22  ;;  %v1264_v0 = vmul.f32 %v1262_v33, %v1258_v10 }
 0x23d   : > { %v1205_v52 = vmul.f32 %v1459_v50, %v1199_v32  ;;  %v1206_v54 = vmul.f32 %v1459_v50, %v1200_v51  ;;  %v1243_v1 = vmul.f32 %v1463_v9, %v1237_v36  ;;  %v1244_v18 = vmul.f32 %v1463_v9, %v1238_v12 }
 0x23e   : > { %v1269_v14 = vmul.f32 %v1465_v43, %v1263_v46  ;;  %v1270_v41 = vmul.f32 %v1465_v43, %v1264_v0 }
 0x23f   : > { %v1211_v58 = vadd.f32 %v1460_v42, %v1205_v52  ;;  %v1212_v35 = vadd.f32 %v1460_v42, %v1206_v54  ;;  %v1249_v57 = vadd.f32 %v1464_v24, %v1243_v1  ;;  %v1250_v26 = vadd.f32 %v1464_v24, %v1244_v18 }
 0x240   : > { %v1275_v16 = vadd.f32 %v1466_v19, %v1269_v14  ;;  %v1276_v23 = vadd.f32 %v1466_v19, %v1270_v41 }
 0x241   : > { %v1461_v59 = vmul.f32 -1.442695, %v1211_v58  ;;  %v1462_v63 = vmul.f32 -1.442695, %v1212_v35 }
 0x243   : > { %1623 = vpow2.f32 %v1461_v59 }
 0x244   : > { %1625 = vpow2.f32 %v1462_v63 }
 0x24d   : > { %v1624_v4 = vpop.eup %1623 }
 0x24e   : > { %v1626_v30 = vpop.eup %1625  ;;  %v1219_v38 = vadd.f32 1.0, %v1624_v4 }
 0x24f   : > { %v1220_v55 = vadd.f32 1.0, %v1626_v30 }
 0x250   : > { %1627 = vrcp.f32 %v1219_v38 }
 0x251   : > { %1629 = vrcp.f32 %v1220_v55 }
 0x25a   : > { %v1628_v53 = vpop.eup %1627 }
 0x25b   : > { %v1630_v15 = vpop.eup %1629  ;;  %v1277_v47 = vmul.f32 %v1628_v53, %v1249_v57 }
 0x25c   : > { %v1278_v17 = vmul.f32 %v1630_v15, %v1250_v26 }
 0x25d   : > { %v1279_v56 = vadd.f32 %v1277_v47, %v1275_v16 }
 0x25e   : > { %v1280_v21 = vadd.f32 %v1278_v17, %v1276_v23 }
 0x25f   : > { %1281 = vst [vmem:[%s313_s6] sm:$0xff] %v1279_v56 }
 0x260   : > { %1282 = vst [vmem:[%s313_s6 + $0x8] sm:$0x1f] %v1280_v21 }
 0x261 PF: > { %p19_p12 = scmp.ge.s32.totalorder %s1936_s10, 4   ;;  %s2364_s18 = smov %s1785_s19 }
 0x262   : > { %s2365_s19 = smov %s1789_s20  ;;  %s2366_s20 = smov %s1947_s15 }
 0x263   : > { %s2367_s21 = smov %s1936_s10  ;;  %21 = sbr.rel (!%p19_p12) target bundleno = 8 (0x8), region = 101 }
 0x26a   :  { %1304 = vsyncpa [#allocation3], 1 }
 0x26b   :  { %1306 = vsyncpa [#allocation3 + $0x1], 1 }
 0x26c   :  { %1307 = vsyncpa [#allocation5], 1 }
 0x26d   :  { %1309 = vsyncpa [#allocation5 + $0x1], 1 }
 0x26e   :  { %1310 = vsyncpa [#allocation8], 1 }

</bundles_post_ra>
